<compile_context>
chip_gen: v7x
topology: tpu7x:2x2x1
jax: 0.10.0
libtpu: 0.0.40
codegen_flags: <defaults>
</compile_context>

<pallas_src>
import functools

import jax
import jax.numpy as jnp
from jax.experimental import pallas as pl
from jax.experimental.pallas import tpu as pltpu


D_IN = 768
H1 = 1000
H_PAD = 1024  # hidden dim 1000 padded up to a lane multiple
H2 = 32


def mlp_kernel(x_ref, w1_ref, b1_ref, w2_ref, b2_ref, w3_ref, b3_ref, o_ref):
    # In-kernel bf16 cast of the activation tile (x arrives as f32).
    x = x_ref[...].astype(jnp.bfloat16)

    # Layer 1 on the MXU: (tb, 768) bf16 @ (768, 1024) bf16 -> f32 accumulate.
    h1 = jnp.dot(x, w1_ref[...], preferred_element_type=jnp.float32)
    h1 = jnp.maximum(h1 + b1_ref[...], 0.0)
    # Keep h1 in bf16: feeds layer-2 MXU natively, limits vreg/VMEM pressure.
    # (Double bf16 rounding is covered by the test tolerance.)
    h1 = h1.astype(jnp.bfloat16)

    # Layer 2 on the MXU: (tb, 1024) bf16 @ (1024, 32) bf16 -> f32 accumulate.
    h2 = jnp.dot(h1, w2_ref[...], preferred_element_type=jnp.float32)
    h2 = jnp.maximum(h2 + b2_ref[...], 0.0)

    # Layer 3: output width 1 -> VPU multiply + lane reduce (skip the MXU).
    out = jnp.sum(h2 * w3_ref[...], axis=-1, keepdims=True) + b3_ref[0, 0]
    o_ref[...] = out.astype(o_ref.dtype)


def prepare_params(w1, b1, w2, b2, w3, b3):
    """One-time preprocessing: pad hidden dim 1000->1024 (exact: zero W1
    columns, zero b1 entries, zero W2 rows), cast the big weights to bf16,
    reshape biases.  Do this ONCE and reuse the result across calls."""
    w1p = jnp.pad(w1, ((0, 0), (0, H_PAD - w1.shape[1]))).astype(jnp.bfloat16)
    b1p = jnp.pad(b1.reshape(1, -1), ((0, 0), (0, H_PAD - b1.size)))           # (1,1024) f32
    w2p = jnp.pad(w2, ((0, H_PAD - w2.shape[0]), (0, 0))).astype(jnp.bfloat16)  # (1024,32)
    b2r = b2.reshape(1, -1)                                                     # (1, 32) f32
    w3r = w3.reshape(1, -1)                                                     # (1, 32) f32
    b3s = b3.reshape(1, 1)                                                      # (1, 1)  f32 -> SMEM
    return (w1p, b1p, w2p, b2r, w3r, b3s)


@jax.jit
def mlp_forward(x, w1p, b1p, w2p, b2r, w3r, b3s):
    """x: (B, 768) f32.  Remaining args come from prepare_params()."""
    B, d_in = x.shape
    assert d_in == D_IN

    # Batch tiling: one tile for small B, 256-row tiles for large B.
    tb = min(256, max(8, B))
    tb = ((tb + 7) // 8) * 8                 # sublane multiple
    B_pad = ((B + tb - 1) // tb) * tb
    if B_pad != B:
        x = jnp.pad(x, ((0, B_pad - B), (0, 0)))
    grid_len = B_pad // tb

    # Advisory cost estimate for the XLA scheduler.
    flops = 2 * B_pad * (D_IN * H_PAD + H_PAD * H2 + H2)
    bytes_accessed = (
        B_pad * D_IN * 4                      # x (f32, cast in kernel)
        + w1p.size * 2 + w2p.size * 2         # bf16 weights
        + b1p.size * 4 + b2r.size * 4 + w3r.size * 4 + 4
        + B_pad * 1 * 4                       # output
    )
    cost = pl.CostEstimate(flops=flops, transcendentals=0,
                           bytes_accessed=bytes_accessed)

    out = pl.pallas_call(
        mlp_kernel,
        out_shape=jax.ShapeDtypeStruct((B_pad, 1), jnp.float32),
        grid_spec=pltpu.PrefetchScalarGridSpec(
            num_scalar_prefetch=0,
            grid=(grid_len,),
            in_specs=[
                pl.BlockSpec((tb, D_IN), lambda i: (i, 0)),       # x tile (f32)
                pl.BlockSpec((D_IN, H_PAD), lambda i: (0, 0)),    # W1 (bf16, resident)
                pl.BlockSpec((1, H_PAD), lambda i: (0, 0)),       # b1 (f32)
                pl.BlockSpec((H_PAD, H2), lambda i: (0, 0)),      # W2 (bf16, resident)
                pl.BlockSpec((1, H2), lambda i: (0, 0)),          # b2 (f32)
                pl.BlockSpec((1, H2), lambda i: (0, 0)),          # w3 row (f32)
                pl.BlockSpec(memory_space=pltpu.MemorySpace.SMEM),  # b3 scalar
            ],
            out_specs=pl.BlockSpec((tb, 1), lambda i: (i, 0)),
        ),
        compiler_params=pltpu.CompilerParams(
            # Weights have constant index_maps (fetched once per core), so
            # sharding the batch grid across v7x's two TensorCores is ~free.
            dimension_semantics=("parallel",),
        ),
        cost_estimate=cost,
    )(x, w1p, b1p, w2p, b2r, w3r, b3s)

    return out[:B]


def init_params(key):
    # torch.nn.Linear-style init: U(-1/sqrt(fan_in), 1/sqrt(fan_in)).
    ks = jax.random.split(key, 6)

    def lin(kw, kb, fan_in, fan_out):
        bound = 1.0 / (fan_in ** 0.5)
        w = jax.random.uniform(kw, (fan_in, fan_out), jnp.float32, -bound, bound)
        b = jax.random.uniform(kb, (fan_out,), jnp.float32, -bound, bound)
        return w, b

    w1, b1 = lin(ks[0], ks[1], D_IN, H1)
    w2, b2 = lin(ks[2], ks[3], H1, H2)
    w3, b3 = lin(ks[4], ks[5], H2, 1)
    return w1, b1, w2, b2, w3, b3


if __name__ == "__main__":
    key = jax.random.PRNGKey(0)
    k_x, k_p = jax.random.split(key)
    B = 16
    x = jax.random.normal(k_x, (B, D_IN), jnp.float32)
    w1, b1, w2, b2, w3, b3 = init_params(k_p)

    # One-time weight preprocessing (hoisted out of the per-call path).
    params = prepare_params(w1, b1, w2, b2, w3, b3)
    params = jax.block_until_ready(params)

    out = mlp_forward(x, *params)
    out = jax.block_until_ready(out)

    # Pure-JAX f32 reference (kernel uses bf16 weights/activations internally,
    # so compare with a tolerance appropriate for a 768-deep bf16 contraction).
    ref = jnp.maximum(x @ w1 + b1, 0.0)
    ref = jnp.maximum(ref @ w2 + b2, 0.0)
    ref = ref @ w3 + b3

    assert out.shape == (B, 1)
    assert jnp.allclose(out, ref, atol=3e-2, rtol=3e-2), (
        float(jnp.max(jnp.abs(out - ref))))

    print("KERNEL_OK")
</pallas_src>

<mosaic_0001>
module attributes {stable_mosaic.version = 11 : i64} {
  func.func @mlp_kernel(%arg0: i32, %arg1: memref<16x768xf32, #tpu.memory_space<vmem>>, %arg2: memref<768x1024xbf16, #tpu.memory_space<vmem>>, %arg3: memref<1x1024xf32, #tpu.memory_space<vmem>>, %arg4: memref<1024x32xbf16, #tpu.memory_space<vmem>>, %arg5: memref<1x32xf32, #tpu.memory_space<vmem>>, %arg6: memref<1x32xf32, #tpu.memory_space<vmem>>, %arg7: memref<1x1xf32, #tpu.memory_space<smem>>, %arg8: memref<16x1xf32, #tpu.memory_space<vmem>>) attributes {dimension_semantics = [#tpu.dimension_semantics<parallel>], iteration_bounds = array<i64: 1>, scalar_prefetch = 0 : i64, scratch_operands = 0 : i64, tpu.core_type = #tpu.core_type<tc>, window_params = [{transform_indices = @transform_0, window_bounds = array<i64: 16, 768>}, {pipeline_mode = #tpu.pipeline_mode<synchronous>, transform_indices = @transform_1, window_bounds = array<i64: 768, 1024>}, {pipeline_mode = #tpu.pipeline_mode<synchronous>, transform_indices = @transform_2, window_bounds = array<i64: 1, 1024>}, {pipeline_mode = #tpu.pipeline_mode<synchronous>, transform_indices = @transform_3, window_bounds = array<i64: 1024, 32>}, {pipeline_mode = #tpu.pipeline_mode<synchronous>, transform_indices = @transform_4, window_bounds = array<i64: 1, 32>}, {pipeline_mode = #tpu.pipeline_mode<synchronous>, transform_indices = @transform_5, window_bounds = array<i64: 1, 32>}, {transform_indices = @transform_6, window_bounds = array<i64: 1, 1>}, {transform_indices = @transform_7, window_bounds = array<i64: 16, 1>}]} {
    %c0 = arith.constant 0 : index
    %c0_0 = arith.constant 0 : index
    %0 = vector.load %arg1[%c0, %c0_0] : memref<16x768xf32, #tpu.memory_space<vmem>>, vector<16x768xf32>
    %1 = arith.truncf %0 : vector<16x768xf32> to vector<16x768xbf16>
    %c0_1 = arith.constant 0 : index
    %c0_2 = arith.constant 0 : index
    %2 = vector.load %arg2[%c0_1, %c0_2] : memref<768x1024xbf16, #tpu.memory_space<vmem>>, vector<768x1024xbf16>
    %cst = arith.constant dense<0.000000e+00> : vector<16x1024xf32>
    %3 = tpu.matmul %1, %2, %cst {dimension_numbers = #tpu.dot_dimension_numbers<[1], [0], [0], [1], [0, 0, 1, 1], [], []>} : vector<16x768xbf16>, vector<768x1024xbf16>, vector<16x1024xf32> -> vector<16x1024xf32>
    %c0_3 = arith.constant 0 : index
    %c0_4 = arith.constant 0 : index
    %4 = vector.load %arg3[%c0_3, %c0_4] : memref<1x1024xf32, #tpu.memory_space<vmem>>, vector<1x1024xf32>
    %5 = vector.broadcast %4 : vector<1x1024xf32> to vector<16x1024xf32>
    %6 = arith.addf %3, %5 : vector<16x1024xf32>
    %cst_5 = arith.constant 0.000000e+00 : f32
    %7 = vector.broadcast %cst_5 : f32 to vector<16x1024xf32>
    %8 = arith.maximumf %6, %7 : vector<16x1024xf32>
    %9 = arith.truncf %8 : vector<16x1024xf32> to vector<16x1024xbf16>
    %c0_6 = arith.constant 0 : index
    %c0_7 = arith.constant 0 : index
    %10 = vector.load %arg4[%c0_6, %c0_7] : memref<1024x32xbf16, #tpu.memory_space<vmem>>, vector<1024x32xbf16>
    %cst_8 = arith.constant dense<0.000000e+00> : vector<16x32xf32>
    %11 = tpu.matmul %9, %10, %cst_8 {dimension_numbers = #tpu.dot_dimension_numbers<[1], [0], [0], [1], [0, 0, 1, 1], [], []>} : vector<16x1024xbf16>, vector<1024x32xbf16>, vector<16x32xf32> -> vector<16x32xf32>
    %c0_9 = arith.constant 0 : index
    %c0_10 = arith.constant 0 : index
    %12 = vector.load %arg5[%c0_9, %c0_10] : memref<1x32xf32, #tpu.memory_space<vmem>>, vector<1x32xf32>
    %13 = vector.broadcast %12 : vector<1x32xf32> to vector<16x32xf32>
    %14 = arith.addf %11, %13 : vector<16x32xf32>
    %cst_11 = arith.constant 0.000000e+00 : f32
    %15 = vector.broadcast %cst_11 : f32 to vector<16x32xf32>
    %16 = arith.maximumf %14, %15 : vector<16x32xf32>
    %c0_12 = arith.constant 0 : index
    %c0_13 = arith.constant 0 : index
    %17 = vector.load %arg6[%c0_12, %c0_13] : memref<1x32xf32, #tpu.memory_space<vmem>>, vector<1x32xf32>
    %18 = vector.broadcast %17 : vector<1x32xf32> to vector<16x32xf32>
    %19 = arith.mulf %16, %18 : vector<16x32xf32>
    %cst_14 = arith.constant dense<0.000000e+00> : vector<16xf32>
    %20 = vector.multi_reduction <add>, %19, %cst_14 [1] : vector<16x32xf32> to vector<16xf32>
    %21 = vector.shape_cast %20 : vector<16xf32> to vector<16x1xf32>
    %c0_15 = arith.constant 0 : index
    %c0_16 = arith.constant 0 : index
    %22 = memref.load %arg7[%c0_15, %c0_16] : memref<1x1xf32, #tpu.memory_space<smem>>
    %23 = vector.broadcast %22 : f32 to vector<16x1xf32>
    %24 = arith.addf %21, %23 : vector<16x1xf32>
    %c0_17 = arith.constant 0 : index
    %c0_18 = arith.constant 0 : index
    %25 = vector.load %arg8[%c0_17, %c0_18] : memref<16x1xf32, #tpu.memory_space<vmem>>, vector<16x1xf32>
    tpu.vector_store %arg8[%c0_17, %c0_18], %24 {strides = array<i32>} : memref<16x1xf32, #tpu.memory_space<vmem>>, vector<16x1xf32>,
    return
  }
  func.func @transform_0(%arg0: i32) -> (i32, i32) {
    %c0_i32 = arith.constant 0 : i32
    %c0_i32_0 = arith.constant 0 : i32
    return %arg0, %c0_i32 : i32, i32
  }
  func.func @transform_1(%arg0: i32) -> (i32, i32) {
    %c0_i32 = arith.constant 0 : i32
    %c0_i32_0 = arith.constant 0 : i32
    %c0_i32_1 = arith.constant 0 : i32
    return %c0_i32, %c0_i32_0 : i32, i32
  }
  func.func @transform_2(%arg0: i32) -> (i32, i32) {
    %c0_i32 = arith.constant 0 : i32
    %c0_i32_0 = arith.constant 0 : i32
    %c0_i32_1 = arith.constant 0 : i32
    return %c0_i32, %c0_i32_0 : i32, i32
  }
  func.func @transform_3(%arg0: i32) -> (i32, i32) {
    %c0_i32 = arith.constant 0 : i32
    %c0_i32_0 = arith.constant 0 : i32
    %c0_i32_1 = arith.constant 0 : i32
    return %c0_i32, %c0_i32_0 : i32, i32
  }
  func.func @transform_4(%arg0: i32) -> (i32, i32) {
    %c0_i32 = arith.constant 0 : i32
    %c0_i32_0 = arith.constant 0 : i32
    %c0_i32_1 = arith.constant 0 : i32
    return %c0_i32, %c0_i32_0 : i32, i32
  }
  func.func @transform_5(%arg0: i32) -> (i32, i32) {
    %c0_i32 = arith.constant 0 : i32
    %c0_i32_0 = arith.constant 0 : i32
    %c0_i32_1 = arith.constant 0 : i32
    return %c0_i32, %c0_i32_0 : i32, i32
  }
  func.func @transform_6(%arg0: i32) -> (i32, i32) {
    %c0_i32 = arith.constant 0 : i32
    %c0_i32_0 = arith.constant 0 : i32
    %c0_i32_1 = arith.constant 0 : i32
    return %c0_i32, %c0_i32_0 : i32, i32
  }
  func.func @transform_7(%arg0: i32) -> (i32, i32) {
    %c0_i32 = arith.constant 0 : i32
    %c0_i32_0 = arith.constant 0 : i32
    return %arg0, %c0_i32 : i32, i32
  }
}

</mosaic_0001>

<bundles_post_ra>
// kernel: mlp_forward.1
= control target key start
LH: loop header
LB: loop body
LE: loop exit
PB: predicated region body
PF: predicated region fallthrough
CT: control target
= control target key end

     0   :  { %13 = vsyncpa [#allocation4], 0  ;;  %s4850_s0 = inlined_call_operand.hbm [shape: f32[16,768], index: 0, kind: input, shape index: {}]   ;;  %s4851_s1 = inlined_call_operand.hbm [shape: bf16[768,1024], index: 1, kind: input, shape index: {}]   ;;  %s4852_s2 = inlined_call_operand.hbm [shape: f32[1,1024], index: 2, kind: input, shape index: {}]   ;;  %s4853_s3 = inlined_call_operand.vmem [shape: bf16[1024,32], index: 3, kind: input, shape index: {}]   ;;  %s4854_s4 = inlined_call_operand.hbm [shape: f32[1,32], index: 4, kind: input, shape index: {}]   ;;  %s4855_s5 = inlined_call_operand.hbm [shape: f32[1,32], index: 5, kind: input, shape index: {}]   ;;  %s4856_s6 = inlined_call_operand.<no memory space> [shape: f32[1,1], index: 6, kind: input, shape index: {}]   ;;  %s4857_s7 = inlined_call_operand.vmem [shape: f32[16,1], index: 7, kind: output, shape index: {}]  }
   0x1   :  { %14 = vsyncpa [#allocation6], 0 }
   0x2   :  { %15 = vsyncpa [#allocation9], 0  ;;  %s4484_s24 = smov [#allocation5]   ;;  %s4368_s28 = scalar_lea.hbm %s4851_s1, 49152 }
   0x3   :  { %s33_s25 = sshll.u32 %s4484_s24, 4  ;;  %p4369_p0 = scmp.ne.s32.totalorder %s4851_s1, %s4368_s28  ;;  %s34_s25 = int_to_ptr.vmem [resolvable:$true] %s33_s25 }
   0x4   :  { %p4372_p1 = scmp.lt.u32.totalorder %s4368_s28, %s4851_s1 }
   0x6   :  { %p4374_p2 = pnand %p4372_p1, %p4369_p0 }
   0x8   :  { %4377 = shalt.err (!%p4374_p2)
}
   0x9   :  { %s4378_s10 = scalar_lea.vmem %s34_s25, 49152  ;;  %p4383_p4 = scmp.lt.s32.totalorder %s34_s25, %s34_s25 }
   0xa   :  { %p4379_p3 = scmp.ne.s32.totalorder %s34_s25, %s4378_s10  ;;  %p4384_p5 = scmp.lt.s32.totalorder %s4378_s10, %s4378_s10 }
   0xc   :  { %p4385_p6 = por %p4384_p5, %p4383_p4 }
   0xe   :  { %p4386_p7 = pnand %p4385_p6, %p4379_p3 }
  0x10   :  { %4389 = shalt.err (!%p4386_p7)
}
  0x11   :  { %s4485_s11 = smov 512   ;;  %s4486_s12 = smov 32  }
  0x12   :  { %39 = dma.hbm_to_vmem [thread:$0]  %s4851_s1, 49152, %s34_s25, [#allocation6], %s4485_s11, %s4485_s11, %s4486_s12  }
  0x13   :  { %s4487_s15 = smov [#allocation8]   ;;  %s4488_s17 = smov [#allocation3]  }
  0x14   :  { %s58_s16 = sshll.u32 %s4487_s15, 4  ;;  %s21_s18 = sshll.u32 %s4488_s17, 4  ;;  %s59_s16 = int_to_ptr.vmem [resolvable:$true] %s58_s16  ;;  %s22_s18 = int_to_ptr.vmem [resolvable:$true] %s21_s18 }
  0x15   :  { %s4390_s21 = scalar_lea.hbm %s4854_s4, 16 }
  0x16   :  { %p4391_p8 = scmp.ne.s32.totalorder %s4854_s4, %s4390_s21  ;;  %p4394_p9 = scmp.lt.u32.totalorder %s4390_s21, %s4854_s4 }
  0x18   :  { %p4396_p10 = pnand %p4394_p9, %p4391_p8 }
  0x1a   :  { %4399 = shalt.err (!%p4396_p10)
}
  0x1b   :  { %s4400_s1 = scalar_lea.vmem %s59_s16, 16  ;;  %s4404_s25 = scalar_lea.vmem %s59_s16, 32 }
  0x1c   :  { %p4401_p11 = scmp.ne.s32.totalorder %s59_s16, %s4400_s1  ;;  %p4405_p12 = scmp.lt.s32.totalorder %s59_s16, %s59_s16 }
  0x1d   :  { %p4406_p13 = scmp.lt.s32.totalorder %s4404_s25, %s4400_s1 }
  0x1f   :  { %p4407_p0 = por %p4406_p13, %p4405_p12 }
  0x21   :  { %p4408_p1 = pnand %p4407_p0, %p4401_p11 }
  0x23   :  { %4411 = shalt.err (!%p4408_p1)
}
  0x24   :  { %61 = dma.hbm_to_vmem [thread:$0]  %s4854_s4, 16, %s59_s16, [#allocation9]  }
  0x25   :  { %s4412_s8 = scalar_lea.hbm %s4850_s0, 1536 }
  0x26   :  { %p4413_p2 = scmp.ne.s32.totalorder %s4850_s0, %s4412_s8  ;;  %p4416_p3 = scmp.lt.u32.totalorder %s4412_s8, %s4850_s0 }
  0x28   :  { %p4418_p4 = pnand %p4416_p3, %p4413_p2 }
  0x2a   :  { %4421 = shalt.err (!%p4418_p4)
}
  0x2b   :  { %s4422_s13 = scalar_lea.vmem %s22_s18, 1536  ;;  %p4427_p6 = scmp.lt.s32.totalorder %s22_s18, %s22_s18 }
  0x2c   :  { %p4423_p5 = scmp.ne.s32.totalorder %s22_s18, %s4422_s13  ;;  %p4428_p7 = scmp.lt.s32.totalorder %s4422_s13, %s4422_s13 }
  0x2e   :  { %p4429_p8 = por %p4428_p7, %p4427_p6 }
  0x30   :  { %p4430_p9 = pnand %p4429_p8, %p4423_p5 }
  0x32   :  { %4433 = shalt.err (!%p4430_p9)
}
  0x33   :  { %s4489_s4 = smov 768   ;;  %s4490_s14 = smov 48  }
  0x34   :  { %27 = dma.hbm_to_vmem [thread:$0]  %s4850_s0, 1536, %s22_s18, [#allocation4], %s4489_s4, %s4489_s4, %s4490_s14  }
  0x35   :  { %s4491_s17 = smov [#allocation7]   ;;  %s4492_s20 = smov [#allocation10]  }
  0x36   :  { %s46_s19 = sshll.u32 %s4491_s17, 4  ;;  %s68_s21 = sshll.u32 %s4492_s20, 4  ;;  %s47_s19 = int_to_ptr.vmem [resolvable:$true] %s46_s19  ;;  %s69_s21 = int_to_ptr.vmem [resolvable:$true] %s68_s21 }
  0x37   :  { %s4434_s24 = scalar_lea.hbm %s4852_s2, 128 }
  0x38   :  { %p4435_p10 = scmp.ne.s32.totalorder %s4852_s2, %s4434_s24  ;;  %p4438_p11 = scmp.lt.u32.totalorder %s4434_s24, %s4852_s2 }
  0x3a   :  { %p4440_p12 = pnand %p4438_p11, %p4435_p10 }
  0x3c   :  { %4443 = shalt.err (!%p4440_p12)
}
  0x3d   :  { %s4444_s0 = scalar_lea.vmem %s47_s19, 128  ;;  %p4449_p0 = scmp.lt.s32.totalorder %s47_s19, %s47_s19 }
  0x3e   :  { %p4445_p13 = scmp.ne.s32.totalorder %s47_s19, %s4444_s0  ;;  %p4450_p1 = scmp.lt.s32.totalorder %s4444_s0, %s4444_s0 }
  0x40   :  { %p4451_p2 = por %p4450_p1, %p4449_p0 }
  0x42   :  { %p4452_p3 = pnand %p4451_p2, %p4445_p13 }
  0x44   :  { %4455 = shalt.err (!%p4452_p3)
}
  0x45   :  { %49 = dma.hbm_to_vmem [thread:$0]  %s4852_s2, 128, %s47_s19, [#allocation6]  }
  0x46   :  { %s4456_s8 = scalar_lea.hbm %s4855_s5, 16 }
  0x47   :  { %p4457_p4 = scmp.ne.s32.totalorder %s4855_s5, %s4456_s8  ;;  %p4460_p5 = scmp.lt.u32.totalorder %s4456_s8, %s4855_s5 }
  0x49   :  { %p4462_p6 = pnand %p4460_p5, %p4457_p4 }
  0x4b   :  { %4465 = shalt.err (!%p4462_p6)
}
  0x4c   :  { %s4466_s13 = scalar_lea.vmem %s69_s21, 16  ;;  %s4470_s4 = scalar_lea.vmem %s69_s21, 32 }
  0x4d   :  { %p4467_p7 = scmp.ne.s32.totalorder %s69_s21, %s4466_s13  ;;  %p4471_p8 = scmp.lt.s32.totalorder %s69_s21, %s69_s21 }
  0x4e   :  { %p4472_p9 = scmp.lt.s32.totalorder %s4470_s4, %s4466_s13 }
  0x50   :  { %p4473_p10 = por %p4472_p9, %p4471_p8 }
  0x52   :  { %p4474_p11 = pnand %p4473_p10, %p4467_p7 }
  0x54   :  { %4477 = shalt.err (!%p4474_p11)
}
  0x55   :  { %71 = dma.hbm_to_vmem [thread:$0]  %s4855_s5, 16, %s69_s21, [#allocation9]  }
  0x56   :  { %4478 = dma.done.wait [#allocation4], 1536  }
  0x57   :  { %4479 = vsyncadd [#allocation4], 4294965760 }
  0x58   :  { %4480 = dma.done.wait [#allocation6], 49280  }
  0x59   :  { %4481 = vsyncadd [#allocation6], 4294918016 }
  0x5a   :  { %4482 = dma.done.wait [#allocation9], 32  }
  0x5b   :  { %4483 = vsyncadd [#allocation9], 4294967264  ;;  %v108_v0 = vld [vmem:[#allocation5] sm:$0xff]  ;;  %v109_v2 = vld [vmem:[#allocation5 + $0x8] sm:$0xff]  ;;  %vm3688_vm0 = vcmask 261120   ;;  %vm3699_vm1 = vcmask 7168  }
  0x5c   :  { %v112_v1 = vld [vmem:[#allocation5 + $0x20] sm:$0xff]  ;;  %v113_v4 = vld [vmem:[#allocation5 + $0x28] sm:$0xff]  ;;  %v97_v54 = vld [vmem:[#allocation3 + $0x38] sm:$0xff] }
  0x5d   :  { %v3710_v3 = vcombine.high %v108_v0, %v112_v1  ;;  %v3709_v5 = vcombine.low %v108_v0, %v112_v1  ;;  %v116_v6 = vld [vmem:[#allocation5 + $0x40] sm:$0xff]  ;;  %v3712_v8 = vcombine.high %v109_v2, %v113_v4  ;;  %v3711_v9 = vcombine.low %v109_v2, %v113_v4  ;;  %v117_v11 = vld [vmem:[#allocation5 + $0x48] sm:$0xff] }
  0x5e   :  { %v120_v7 = vld [vmem:[#allocation5 + $0x60] sm:$0xff]  ;;  %v121_v12 = vld [vmem:[#allocation5 + $0x68] sm:$0xff] }
  0x5f   :  { %v3718_v10 = vcombine.high %v116_v6, %v120_v7  ;;  %v124_v13 = vld [vmem:[#allocation5 + $0x80] sm:$0xff]  ;;  %2454 = vmatprep.subr.bf16.mxu0 %v3710_v3  ;;  %v3720_v14 = vcombine.high %v117_v11, %v121_v12  ;;  %v125_v16 = vld [vmem:[#allocation5 + $0x88] sm:$0xff]  ;;  %2583 = vmatprep.subr.bf16.mxu1 %v3712_v8  ;;  %v3717_v18 = vcombine.low %v116_v6, %v120_v7 }
  0x60   :  { %v128_v15 = vld [vmem:[#allocation5 + $0xa0] sm:$0xff]  ;;  %v129_v17 = vld [vmem:[#allocation5 + $0xa8] sm:$0xff]  ;;  %2455 = vmatpush1.bf16.msra.mxu0 %v3709_v5  ;;  %2584 = vmatpush1.bf16.msra.mxu1 %v3711_v9  ;;  %v3719_v19 = vcombine.low %v117_v11, %v121_v12 }
  0x61   :  { %2456 = vmatprep.subr.bf16.mxu0 %v3718_v10  ;;  %v3726_v20 = vcombine.high %v124_v13, %v128_v15  ;;  %2585 = vmatprep.subr.bf16.mxu1 %v3720_v14  ;;  %v3728_v21 = vcombine.high %v125_v16, %v129_v17  ;;  %v132_v22 = vld [vmem:[#allocation5 + $0xc0] sm:$0xff]  ;;  %v133_v24 = vld [vmem:[#allocation5 + $0xc8] sm:$0xff]  ;;  %v3725_v26 = vcombine.low %v124_v13, %v128_v15 }
  0x62   :  { %v136_v23 = vld [vmem:[#allocation5 + $0xe0] sm:$0xff]  ;;  %v137_v25 = vld [vmem:[#allocation5 + $0xe8] sm:$0xff]  ;;  %v3727_v27 = vcombine.low %v125_v16, %v129_v17 }
  0x63   :  { %v3734_v28 = vcombine.high %v132_v22, %v136_v23  ;;  %v3736_v29 = vcombine.high %v133_v24, %v137_v25  ;;  %v140_v30 = vld [vmem:[#allocation5 + $0x100] sm:$0xff]  ;;  %v141_v32 = vld [vmem:[#allocation5 + $0x108] sm:$0xff]  ;;  %v3733_v34 = vcombine.low %v132_v22, %v136_v23  ;;  %v3735_v35 = vcombine.low %v133_v24, %v137_v25 }
  0x64   :  { %2457 = vmatpush1.bf16.msra.mxu0 %v3717_v18  ;;  %2586 = vmatpush1.bf16.msra.mxu1 %v3719_v19  ;;  %v144_v31 = vld [vmem:[#allocation5 + $0x120] sm:$0xff]  ;;  %v145_v33 = vld [vmem:[#allocation5 + $0x128] sm:$0xff] }
  0x65   :  { %2458 = vmatprep.subr.bf16.mxu0 %v3726_v20  ;;  %2587 = vmatprep.subr.bf16.mxu1 %v3728_v21  ;;  %v3742_v36 = vcombine.high %v140_v30, %v144_v31  ;;  %v3744_v37 = vcombine.high %v141_v32, %v145_v33  ;;  %v148_v38 = vld [vmem:[#allocation5 + $0x140] sm:$0xff]  ;;  %v149_v40 = vld [vmem:[#allocation5 + $0x148] sm:$0xff]  ;;  %v3741_v42 = vcombine.low %v140_v30, %v144_v31 }
  0x66   :  { %v152_v39 = vld [vmem:[#allocation5 + $0x160] sm:$0xff]  ;;  %v153_v41 = vld [vmem:[#allocation5 + $0x168] sm:$0xff]  ;;  %v3743_v43 = vcombine.low %v141_v32, %v145_v33 }
  0x67   :  { %v3750_v44 = vcombine.high %v148_v38, %v152_v39  ;;  %v3752_v45 = vcombine.high %v149_v40, %v153_v41  ;;  %v156_v46 = vld [vmem:[#allocation5 + $0x180] sm:$0xff]  ;;  %v157_v48 = vld [vmem:[#allocation5 + $0x188] sm:$0xff]  ;;  %v3749_v50 = vcombine.low %v148_v38, %v152_v39  ;;  %v3751_v51 = vcombine.low %v149_v40, %v153_v41 }
  0x68   :  { %2459 = vmatpush1.bf16.msra.mxu0 %v3725_v26  ;;  %2588 = vmatpush1.bf16.msra.mxu1 %v3727_v27  ;;  %v160_v47 = vld [vmem:[#allocation5 + $0x1a0] sm:$0xff]  ;;  %v161_v49 = vld [vmem:[#allocation5 + $0x1a8] sm:$0xff] }
  0x69   :  { %2460 = vmatprep.subr.bf16.mxu0 %v3734_v28  ;;  %2589 = vmatprep.subr.bf16.mxu1 %v3736_v29  ;;  %v3758_v52 = vcombine.high %v156_v46, %v160_v47  ;;  %v91_v53 = vld [vmem:[#allocation3 + $0x8] sm:$0xff]  ;;  %v3760_v55 = vcombine.high %v157_v48, %v161_v49  ;;  %v164_v56 = vld [vmem:[#allocation5 + $0x1c0] sm:$0xff]  ;;  %v3757_v61 = vcombine.low %v156_v46, %v160_v47 }
  0x6a   :  { %v168_v57 = vld [vmem:[#allocation5 + $0x1e0] sm:$0xff]  ;;  %v4593_v58 = vpack.c.bf16 %v97_v54, %v91_v53  ;;  %v165_v59 = vld [vmem:[#allocation5 + $0x1c8] sm:$0xff]  ;;  %v3759_v62 = vcombine.low %v157_v48, %v161_v49 }
  0x6b   :  { %v169_v60 = vld [vmem:[#allocation5 + $0x1e8] sm:$0xff]  ;;  %v3766_v63 = vcombine.high %v164_v56, %v168_v57  ;;  %v172_v1 = vld [vmem:[#allocation5 + $0x200] sm:$0xff]  ;;  %v3765_v5 = vcombine.low %v164_v56, %v168_v57 }
  0x6c   :  { %2461 = vmatpush1.bf16.msra.mxu0 %v3733_v34  ;;  %2590 = vmatpush1.bf16.msra.mxu1 %v3735_v35  ;;  %v3768_v0 = vcombine.high %v165_v59, %v169_v60  ;;  %v176_v2 = vld [vmem:[#allocation5 + $0x220] sm:$0xff]  ;;  %v173_v3 = vld [vmem:[#allocation5 + $0x208] sm:$0xff]  ;;  %v3767_v6 = vcombine.low %v165_v59, %v169_v60 }
  0x6d   :  { %2462 = vmatprep.subr.bf16.mxu0 %v3742_v36  ;;  %2591 = vmatprep.subr.bf16.mxu1 %v3744_v37  ;;  %v177_v4 = vld [vmem:[#allocation5 + $0x228] sm:$0xff]  ;;  %v3774_v7 = vcombine.high %v172_v1, %v176_v2  ;;  %v180_v9 = vld [vmem:[#allocation5 + $0x240] sm:$0xff]  ;;  %v3773_v13 = vcombine.low %v172_v1, %v176_v2 }
  0x6e   :  { %2486 = vmatprep.mubr.bf16.mxu0 %v4593_v58  ;;  %2615 = vmatprep.mubr.bf16.mxu1 %v4593_v58  ;;  %v3776_v8 = vcombine.high %v173_v3, %v177_v4  ;;  %v184_v10 = vld [vmem:[#allocation5 + $0x260] sm:$0xff]  ;;  %v181_v11 = vld [vmem:[#allocation5 + $0x248] sm:$0xff]  ;;  %v3775_v14 = vcombine.low %v173_v3, %v177_v4 }
  0x6f   :  { %v185_v12 = vld [vmem:[#allocation5 + $0x268] sm:$0xff]  ;;  %v3782_v15 = vcombine.high %v180_v9, %v184_v10  ;;  %v188_v17 = vld [vmem:[#allocation5 + $0x280] sm:$0xff]  ;;  %v3781_v21 = vcombine.low %v180_v9, %v184_v10 }
  0x70   :  { %2463 = vmatpush1.bf16.msra.mxu0 %v3741_v42  ;;  %2592 = vmatpush1.bf16.msra.mxu1 %v3743_v43  ;;  %v3784_v16 = vcombine.high %v181_v11, %v185_v12  ;;  %v192_v18 = vld [vmem:[#allocation5 + $0x2a0] sm:$0xff]  ;;  %v189_v19 = vld [vmem:[#allocation5 + $0x288] sm:$0xff]  ;;  %v3783_v22 = vcombine.low %v181_v11, %v185_v12 }
  0x71   :  { %2464 = vmatprep.subr.bf16.mxu0 %v3750_v44  ;;  %2593 = vmatprep.subr.bf16.mxu1 %v3752_v45  ;;  %v193_v20 = vld [vmem:[#allocation5 + $0x2a8] sm:$0xff]  ;;  %v3790_v23 = vcombine.high %v188_v17, %v192_v18  ;;  %v196_v25 = vld [vmem:[#allocation5 + $0x2c0] sm:$0xff]  ;;  %v3789_v29 = vcombine.low %v188_v17, %v192_v18  ;;  %v93_v17 = vld [vmem:[#allocation3 + $0x18] sm:$0xff] }
  0x72   :  { %v3792_v24 = vcombine.high %v189_v19, %v193_v20  ;;  %v200_v26 = vld [vmem:[#allocation5 + $0x2e0] sm:$0xff]  ;;  %v197_v27 = vld [vmem:[#allocation5 + $0x2c8] sm:$0xff]  ;;  %v3791_v30 = vcombine.low %v189_v19, %v193_v20 }
  0x73   :  { %v201_v28 = vld [vmem:[#allocation5 + $0x2e8] sm:$0xff]  ;;  %v3798_v31 = vcombine.high %v196_v25, %v200_v26  ;;  %v204_v33 = vld [vmem:[#allocation5 + $0x300] sm:$0xff]  ;;  %v3797_v37 = vcombine.low %v196_v25, %v200_v26 }
  0x74   :  { %2465 = vmatpush1.bf16.msra.mxu0 %v3749_v50  ;;  %2594 = vmatpush1.bf16.msra.mxu1 %v3751_v51  ;;  %v3800_v32 = vcombine.high %v197_v27, %v201_v28  ;;  %v208_v34 = vld [vmem:[#allocation5 + $0x320] sm:$0xff]  ;;  %v205_v35 = vld [vmem:[#allocation5 + $0x308] sm:$0xff]  ;;  %v3799_v38 = vcombine.low %v197_v27, %v201_v28 }
  0x75   :  { %2466 = vmatprep.subr.bf16.mxu0 %v3758_v52  ;;  %2595 = vmatprep.subr.bf16.mxu1 %v3760_v55  ;;  %v209_v36 = vld [vmem:[#allocation5 + $0x328] sm:$0xff]  ;;  %v3806_v39 = vcombine.high %v204_v33, %v208_v34  ;;  %v212_v41 = vld [vmem:[#allocation5 + $0x340] sm:$0xff]  ;;  %v3805_v45 = vcombine.low %v204_v33, %v208_v34 }
  0x76   :  { %v3808_v40 = vcombine.high %v205_v35, %v209_v36  ;;  %v216_v42 = vld [vmem:[#allocation5 + $0x360] sm:$0xff]  ;;  %v213_v43 = vld [vmem:[#allocation5 + $0x348] sm:$0xff]  ;;  %v3807_v46 = vcombine.low %v205_v35, %v209_v36 }
  0x77   :  { %v217_v44 = vld [vmem:[#allocation5 + $0x368] sm:$0xff]  ;;  %v3814_v47 = vcombine.high %v212_v41, %v216_v42  ;;  %v220_v49 = vld [vmem:[#allocation5 + $0x380] sm:$0xff]  ;;  %v3813_v53 = vcombine.low %v212_v41, %v216_v42 }
  0x78   :  { %2467 = vmatpush1.bf16.msra.mxu0 %v3757_v61  ;;  %2596 = vmatpush1.bf16.msra.mxu1 %v3759_v62  ;;  %v3816_v48 = vcombine.high %v213_v43, %v217_v44  ;;  %v224_v50 = vld [vmem:[#allocation5 + $0x3a0] sm:$0xff]  ;;  %v221_v51 = vld [vmem:[#allocation5 + $0x388] sm:$0xff]  ;;  %v3815_v54 = vcombine.low %v213_v43, %v217_v44 }
  0x79   :  { %2468 = vmatprep.subr.bf16.mxu0 %v3766_v63  ;;  %2597 = vmatprep.subr.bf16.mxu1 %v3768_v0  ;;  %v225_v52 = vld [vmem:[#allocation5 + $0x3a8] sm:$0xff]  ;;  %v3822_v55 = vcombine.high %v220_v49, %v224_v50  ;;  %v228_v57 = vld [vmem:[#allocation5 + $0x3c0] sm:$0xff]  ;;  %v3821_v62 = vcombine.low %v220_v49, %v224_v50 }
  0x7a   :  { %v3824_v56 = vcombine.high %v221_v51, %v225_v52  ;;  %v232_v59 = vld [vmem:[#allocation5 + $0x3e0] sm:$0xff]  ;;  %v229_v60 = vld [vmem:[#allocation5 + $0x3c8] sm:$0xff]  ;;  %v3823_v63 = vcombine.low %v221_v51, %v225_v52 }
  0x7b   :  { %v233_v61 = vld [vmem:[#allocation5 + $0x3e8] sm:$0xff]  ;;  %v3830_v0 = vcombine.high %v228_v57, %v232_v59  ;;  %v236_v2 = vld [vmem:[#allocation5 + $0x400] sm:$0xff] }
  0x7c   :  { %2469 = vmatpush1.bf16.msra.mxu0 %v3765_v5  ;;  %2598 = vmatpush1.bf16.msra.mxu1 %v3767_v6  ;;  %v3832_v1 = vcombine.high %v229_v60, %v233_v61  ;;  %v240_v3 = vld [vmem:[#allocation5 + $0x420] sm:$0xff]  ;;  %v237_v4 = vld [vmem:[#allocation5 + $0x408] sm:$0xff]  ;;  %v3829_v6 = vcombine.low %v228_v57, %v232_v59  ;;  %v3831_v9 = vcombine.low %v229_v60, %v233_v61 }
  0x7d   :  { %2470 = vmatprep.subr.bf16.mxu0 %v3774_v7  ;;  %2599 = vmatprep.subr.bf16.mxu1 %v3776_v8  ;;  %v241_v5 = vld [vmem:[#allocation5 + $0x428] sm:$0xff]  ;;  %v90_v7 = vld [vmem:[#allocation3] sm:$0xff]  ;;  %v96_v8 = vld [vmem:[#allocation3 + $0x30] sm:$0xff]  ;;  %v3838_v10 = vcombine.high %v236_v2, %v240_v3  ;;  %v3837_v19 = vcombine.low %v236_v2, %v240_v3 }
  0x7e   :  { %v3840_v11 = vcombine.high %v237_v4, %v241_v5  ;;  %v244_v12 = vld [vmem:[#allocation5 + $0x440] sm:$0xff]  ;;  %v99_v18 = vld [vmem:[#allocation3 + $0x48] sm:$0xff]  ;;  %v3839_v20 = vcombine.low %v237_v4, %v241_v5 }
  0x7f   :  { %v4599_v25 = vpack.c.bf16 %v99_v18, %v93_v17  ;;  %v253_v26 = vld [vmem:[#allocation5 + $0x488] sm:$0xff]  ;;  %v308_v17 = vld [vmem:[#allocation5 + $0x640] sm:$0xff] }
  0x80   :  { %2471 = vmatpush1.bf16.msra.mxu0 %v3773_v13  ;;  %2600 = vmatpush1.bf16.msra.mxu1 %v3775_v14  ;;  %v248_v13 = vld [vmem:[#allocation5 + $0x460] sm:$0xff]  ;;  %v245_v14 = vld [vmem:[#allocation5 + $0x448] sm:$0xff] }
  0x81   :  { %2472 = vmatprep.subr.bf16.mxu0 %v3782_v15  ;;  %2601 = vmatprep.subr.bf16.mxu1 %v3784_v16  ;;  %v4597_v15 = vpack.c.bf16 %v96_v8, %v90_v7  ;;  %v249_v16 = vld [vmem:[#allocation5 + $0x468] sm:$0xff]  ;;  %v3845_v28 = vcombine.low %v244_v12, %v248_v13  ;;  %v300_v8 = vld [vmem:[#allocation5 + $0x600] sm:$0xff] }
  0x82   :  { %v257_v27 = vld [vmem:[#allocation5 + $0x4a8] sm:$0xff]  ;;  %v312_v18 = vld [vmem:[#allocation5 + $0x660] sm:$0xff] }
  0x83   :  { %v3856_v33 = vcombine.high %v253_v26, %v257_v27  ;;  %v261_v34 = vld [vmem:[#allocation5 + $0x4c8] sm:$0xff] }
  0x84   :  { %2473 = vmatpush1.bf16.msra.mxu0 %v3781_v21  ;;  %2602 = vmatpush1.bf16.msra.mxu1 %v3783_v22  ;;  %v3846_v21 = vcombine.high %v244_v12, %v248_v13  ;;  %v3848_v22 = vcombine.high %v245_v14, %v249_v16  ;;  %v265_v35 = vld [vmem:[#allocation5 + $0x4e8] sm:$0xff] }
  0x85   :  { %2474 = vmatprep.subr.bf16.mxu0 %v3790_v23  ;;  %2603 = vmatprep.subr.bf16.mxu1 %v3792_v24  ;;  %v252_v23 = vld [vmem:[#allocation5 + $0x480] sm:$0xff]  ;;  %v269_v41 = vld [vmem:[#allocation5 + $0x508] sm:$0xff]  ;;  %v3864_v42 = vcombine.high %v261_v34, %v265_v35 }
  0x86   :  { %v256_v24 = vld [vmem:[#allocation5 + $0x4a0] sm:$0xff]  ;;  %v273_v43 = vld [vmem:[#allocation5 + $0x528] sm:$0xff] }
  0x87   :  { %v3853_v36 = vcombine.low %v252_v23, %v256_v24  ;;  %v277_v49 = vld [vmem:[#allocation5 + $0x548] sm:$0xff]  ;;  %v3872_v50 = vcombine.high %v269_v41, %v273_v43 }
  0x88   :  { %2475 = vmatpush1.bf16.msra.mxu0 %v3789_v29  ;;  %2604 = vmatpush1.bf16.msra.mxu1 %v3791_v30  ;;  %v3847_v29 = vcombine.low %v245_v14, %v249_v16  ;;  %v3854_v30 = vcombine.high %v252_v23, %v256_v24  ;;  %v281_v51 = vld [vmem:[#allocation5 + $0x568] sm:$0xff]  ;;  %v3910_v24 = vcombine.high %v308_v17, %v312_v18 }
  0x89   :  { %2476 = vmatprep.subr.bf16.mxu0 %v3798_v31  ;;  %2605 = vmatprep.subr.bf16.mxu1 %v3800_v32  ;;  %v260_v31 = vld [vmem:[#allocation5 + $0x4c0] sm:$0xff]  ;;  %v285_v57 = vld [vmem:[#allocation5 + $0x588] sm:$0xff]  ;;  %v3880_v59 = vcombine.high %v277_v49, %v281_v51 }
  0x8a   :  { %v264_v32 = vld [vmem:[#allocation5 + $0x4e0] sm:$0xff]  ;;  %v289_v60 = vld [vmem:[#allocation5 + $0x5a8] sm:$0xff] }
  0x8b   :  { %v3861_v44 = vcombine.low %v260_v31, %v264_v32  ;;  %v293_v2 = vld [vmem:[#allocation5 + $0x5c8] sm:$0xff]  ;;  %v3888_v3 = vcombine.high %v285_v57, %v289_v60 }
  0x8c   :  { %2477 = vmatpush1.bf16.msra.mxu0 %v3797_v37  ;;  %2606 = vmatpush1.bf16.msra.mxu1 %v3799_v38  ;;  %v3855_v37 = vcombine.low %v253_v26, %v257_v27  ;;  %v3862_v38 = vcombine.high %v260_v31, %v264_v32  ;;  %v297_v4 = vld [vmem:[#allocation5 + $0x5e8] sm:$0xff]  ;;  %v316_v26 = vld [vmem:[#allocation5 + $0x680] sm:$0xff]  ;;  %v3909_v31 = vcombine.low %v308_v17, %v312_v18  ;;  %v92_v17 = vld [vmem:[#allocation3 + $0x10] sm:$0xff] }
  0x8d   :  { %2478 = vmatprep.subr.bf16.mxu0 %v3806_v39  ;;  %2607 = vmatprep.subr.bf16.mxu1 %v3808_v40  ;;  %v268_v39 = vld [vmem:[#allocation5 + $0x500] sm:$0xff]  ;;  %v305_v12 = vld [vmem:[#allocation5 + $0x628] sm:$0xff]  ;;  %v3895_v14 = vcombine.low %v293_v2, %v297_v4 }
  0x8e   :  { %v272_v40 = vld [vmem:[#allocation5 + $0x520] sm:$0xff] }
  0x8f   :  { %v3869_v52 = vcombine.low %v268_v39, %v272_v40  ;;  %v320_v27 = vld [vmem:[#allocation5 + $0x6a0] sm:$0xff] }
  0x90   :  { %2479 = vmatpush1.bf16.msra.mxu0 %v3805_v45  ;;  %2608 = vmatpush1.bf16.msra.mxu1 %v3807_v46  ;;  %v3863_v45 = vcombine.low %v261_v34, %v265_v35  ;;  %v3870_v46 = vcombine.high %v268_v39, %v272_v40  ;;  %v324_v34 = vld [vmem:[#allocation5 + $0x6c0] sm:$0xff]  ;;  %v3917_v39 = vcombine.low %v316_v26, %v320_v27 }
  0x91   :  { %2480 = vmatprep.subr.bf16.mxu0 %v3814_v47  ;;  %2609 = vmatprep.subr.bf16.mxu1 %v3816_v48  ;;  %v276_v47 = vld [vmem:[#allocation5 + $0x540] sm:$0xff] }
  0x92   :  { %v280_v48 = vld [vmem:[#allocation5 + $0x560] sm:$0xff] }
  0x93   :  { %v3877_v61 = vcombine.low %v276_v47, %v280_v48  ;;  %v328_v35 = vld [vmem:[#allocation5 + $0x6e0] sm:$0xff] }
  0x94   :  { %2481 = vmatpush1.bf16.msra.mxu0 %v3813_v53  ;;  %2610 = vmatpush1.bf16.msra.mxu1 %v3815_v54  ;;  %v3871_v53 = vcombine.low %v269_v41, %v273_v43  ;;  %v3878_v54 = vcombine.high %v276_v47, %v280_v48  ;;  %v3926_v41 = vcombine.high %v324_v34, %v328_v35  ;;  %v336_v43 = vld [vmem:[#allocation5 + $0x720] sm:$0xff] }
  0x95   :  { %2482 = vmatprep.subr.bf16.mxu0 %v3822_v55  ;;  %2611 = vmatprep.subr.bf16.mxu1 %v3824_v56  ;;  %v284_v55 = vld [vmem:[#allocation5 + $0x580] sm:$0xff]  ;;  %v3925_v47 = vcombine.low %v324_v34, %v328_v35 }
  0x96   :  { %v288_v56 = vld [vmem:[#allocation5 + $0x5a0] sm:$0xff] }
  0x97   :  { %v3885_v5 = vcombine.low %v284_v55, %v288_v56  ;;  %v98_v18 = vld [vmem:[#allocation3 + $0x40] sm:$0xff] }
  0x98   :  { %2483 = vmatpush1.bf16.msra.mxu0 %v3821_v62  ;;  %2612 = vmatpush1.bf16.msra.mxu1 %v3823_v63  ;;  %v3879_v62 = vcombine.low %v277_v49, %v281_v51  ;;  %v3886_v63 = vcombine.high %v284_v55, %v288_v56  ;;  %v344_v51 = vld [vmem:[#allocation5 + $0x760] sm:$0xff] }
  0x99   :  { %2484 = vmatprep.subr.bf16.mxu0 %v3830_v0  ;;  %2613 = vmatprep.subr.bf16.mxu1 %v3832_v1  ;;  %v292_v0 = vld [vmem:[#allocation5 + $0x5c0] sm:$0xff] }
  0x9a   :  { %v296_v1 = vld [vmem:[#allocation5 + $0x5e0] sm:$0xff] }
  0x9b   :  { %v3894_v7 = vcombine.high %v292_v0, %v296_v1  ;;  %v3893_v13 = vcombine.low %v292_v0, %v296_v1  ;;  %v380_v34 = vld [vmem:[#allocation5 + $0x880] sm:$0xff] }
  0x9c   :  { %2485 = vmatpush1.bf16.msra.mxu0 %v3829_v6  ;;  %2614 = vmatpush1.bf16.msra.mxu1 %v3831_v9  ;;  %v3887_v6 = vcombine.low %v285_v57, %v289_v60  ;;  %v304_v9 = vld [vmem:[#allocation5 + $0x620] sm:$0xff] }
  0x9d   :  { %2497 = vmatprep.subr.bf16.mxu0 %v3838_v10  ;;  %2626 = vmatprep.subr.bf16.mxu1 %v3840_v11  ;;  %v301_v10 = vld [vmem:[#allocation5 + $0x608] sm:$0xff]  ;;  %v3896_v11 = vcombine.high %v293_v2, %v297_v4  ;;  %v3902_v16 = vcombine.high %v300_v8, %v304_v9  ;;  %v352_v60 = vld [vmem:[#allocation5 + $0x7a0] sm:$0xff] }
  0x9e   :  { %v3903_v23 = vcombine.low %v301_v10, %v305_v12  ;;  %v360_v4 = vld [vmem:[#allocation5 + $0x7e0] sm:$0xff] }
  0x9f   :  { %2487 = vmatmul.mubr.bf16.vlgmr.msra.gmra.mrb[0].mxu0 %v4597_v15  ;;  %2616 = vmatmul.mubr.bf16.vlgmr.msra.gmra.mrb[0].mxu1 %v4597_v15  ;;  %v384_v35 = vld [vmem:[#allocation5 + $0x8a0] sm:$0xff] }
  0xa0   :  { %2498 = vmatpush1.bf16.msra.mxu0 %v3837_v19  ;;  %2627 = vmatpush1.bf16.msra.mxu1 %v3839_v20  ;;  %v309_v19 = vld [vmem:[#allocation5 + $0x648] sm:$0xff]  ;;  %v3904_v20 = vcombine.high %v301_v10, %v305_v12  ;;  %v368_v12 = vld [vmem:[#allocation5 + $0x820] sm:$0xff] }
  0xa1   :  { %2499 = vmatprep.subr.bf16.mxu0 %v3846_v21  ;;  %2628 = vmatprep.subr.bf16.mxu1 %v3848_v22  ;;  %v313_v21 = vld [vmem:[#allocation5 + $0x668] sm:$0xff]  ;;  %v3901_v22 = vcombine.low %v300_v8, %v304_v9  ;;  %v364_v9 = vld [vmem:[#allocation5 + $0x800] sm:$0xff] }
  0xa2   :  { %2529 = vmatprep.mubr.bf16.mxu0 %v4599_v25  ;;  %2658 = vmatprep.mubr.bf16.mxu1 %v4599_v25  ;;  %v3911_v32 = vcombine.low %v309_v19, %v313_v21 }
  0xa4   :  { %2500 = vmatpush1.bf16.msra.mxu0 %v3845_v28  ;;  %2629 = vmatpush1.bf16.msra.mxu1 %v3847_v29  ;;  %v317_v28 = vld [vmem:[#allocation5 + $0x688] sm:$0xff]  ;;  %v3912_v29 = vcombine.high %v309_v19, %v313_v21  ;;  %v376_v21 = vld [vmem:[#allocation5 + $0x860] sm:$0xff] }
  0xa5   :  { %2501 = vmatprep.subr.bf16.mxu0 %v3854_v30  ;;  %2630 = vmatprep.subr.bf16.mxu1 %v3856_v33  ;;  %v321_v30 = vld [vmem:[#allocation5 + $0x6a8] sm:$0xff]  ;;  %v3918_v33 = vcombine.high %v316_v26, %v320_v27 }
  0xa6   :  { %v3919_v40 = vcombine.low %v317_v28, %v321_v30  ;;  %v377_v26 = vld [vmem:[#allocation5 + $0x868] sm:$0xff] }
  0xa7   :  { %v95_v27 = vld [vmem:[#allocation3 + $0x28] sm:$0xff] }
  0xa8   :  { %2502 = vmatpush1.bf16.msra.mxu0 %v3853_v36  ;;  %2631 = vmatpush1.bf16.msra.mxu1 %v3855_v37  ;;  %v325_v36 = vld [vmem:[#allocation5 + $0x6c8] sm:$0xff]  ;;  %v3920_v37 = vcombine.high %v317_v28, %v321_v30  ;;  %v4605_v30 = vpack.c.bf16 %v98_v18, %v92_v17 }
  0xa9   :  { %2503 = vmatprep.subr.bf16.mxu0 %v3862_v38  ;;  %2632 = vmatprep.subr.bf16.mxu1 %v3864_v42  ;;  %v329_v38 = vld [vmem:[#allocation5 + $0x6e8] sm:$0xff]  ;;  %v332_v42 = vld [vmem:[#allocation5 + $0x700] sm:$0xff] }
  0xaa   :  { %v3927_v48 = vcombine.low %v325_v36, %v329_v38  ;;  %v3934_v49 = vcombine.high %v332_v42, %v336_v43  ;;  %v3933_v55 = vcombine.low %v332_v42, %v336_v43  ;;  %v3982_v42 = vcombine.high %v380_v34, %v384_v35  ;;  %v425_v17 = vld [vmem:[#allocation5 + $0x9e8] sm:$0xff] }
  0xac   :  { %2504 = vmatpush1.bf16.msra.mxu0 %v3861_v44  ;;  %2633 = vmatpush1.bf16.msra.mxu1 %v3863_v45  ;;  %v333_v44 = vld [vmem:[#allocation5 + $0x708] sm:$0xff]  ;;  %v3928_v45 = vcombine.high %v325_v36, %v329_v38 }
  0xad   :  { %2505 = vmatprep.subr.bf16.mxu0 %v3870_v46  ;;  %2634 = vmatprep.subr.bf16.mxu1 %v3872_v50  ;;  %v337_v46 = vld [vmem:[#allocation5 + $0x728] sm:$0xff]  ;;  %v340_v50 = vld [vmem:[#allocation5 + $0x740] sm:$0xff] }
  0xae   :  { %v3935_v56 = vcombine.low %v333_v44, %v337_v46  ;;  %v3942_v57 = vcombine.high %v340_v50, %v344_v51  ;;  %v3941_v0 = vcombine.low %v340_v50, %v344_v51  ;;  %v381_v36 = vld [vmem:[#allocation5 + $0x888] sm:$0xff] }
  0xaf   :  { %v385_v38 = vld [vmem:[#allocation5 + $0x8a8] sm:$0xff] }
  0xb0   :  { %2506 = vmatpush1.bf16.msra.mxu0 %v3869_v52  ;;  %2635 = vmatpush1.bf16.msra.mxu1 %v3871_v53  ;;  %v341_v52 = vld [vmem:[#allocation5 + $0x748] sm:$0xff]  ;;  %v3936_v53 = vcombine.high %v333_v44, %v337_v46  ;;  %v3984_v43 = vcombine.high %v381_v36, %v385_v38  ;;  %v388_v44 = vld [vmem:[#allocation5 + $0x8c0] sm:$0xff] }
  0xb1   :  { %2507 = vmatprep.subr.bf16.mxu0 %v3878_v54  ;;  %2636 = vmatprep.subr.bf16.mxu1 %v3880_v59  ;;  %v345_v54 = vld [vmem:[#allocation5 + $0x768] sm:$0xff]  ;;  %v348_v59 = vld [vmem:[#allocation5 + $0x780] sm:$0xff] }
  0xb2   :  { %v3943_v1 = vcombine.low %v341_v52, %v345_v54  ;;  %v3950_v2 = vcombine.high %v348_v59, %v352_v60  ;;  %v3949_v8 = vcombine.low %v348_v59, %v352_v60  ;;  %v389_v46 = vld [vmem:[#allocation5 + $0x8c8] sm:$0xff] }
  0xb4   :  { %2508 = vmatpush1.bf16.msra.mxu0 %v3877_v61  ;;  %2637 = vmatpush1.bf16.msra.mxu1 %v3879_v62  ;;  %v349_v61 = vld [vmem:[#allocation5 + $0x788] sm:$0xff]  ;;  %v3944_v62 = vcombine.high %v341_v52, %v345_v54  ;;  %v396_v52 = vld [vmem:[#allocation5 + $0x900] sm:$0xff] }
  0xb5   :  { %2509 = vmatprep.subr.bf16.mxu0 %v3886_v63  ;;  %2638 = vmatprep.subr.bf16.mxu1 %v3888_v3  ;;  %v353_v63 = vld [vmem:[#allocation5 + $0x7a8] sm:$0xff]  ;;  %v356_v3 = vld [vmem:[#allocation5 + $0x7c0] sm:$0xff] }
  0xb6   :  { %v3951_v10 = vcombine.low %v349_v61, %v353_v63  ;;  %v3957_v19 = vcombine.low %v356_v3, %v360_v4  ;;  %v397_v54 = vld [vmem:[#allocation5 + $0x908] sm:$0xff] }
  0xb8   :  { %2510 = vmatpush1.bf16.msra.mxu0 %v3885_v5  ;;  %2639 = vmatpush1.bf16.msra.mxu1 %v3887_v6  ;;  %v357_v5 = vld [vmem:[#allocation5 + $0x7c8] sm:$0xff]  ;;  %v3952_v6 = vcombine.high %v349_v61, %v353_v63  ;;  %v404_v61 = vld [vmem:[#allocation5 + $0x940] sm:$0xff] }
  0xb9   :  { %2511 = vmatprep.subr.bf16.mxu0 %v3894_v7  ;;  %2640 = vmatprep.subr.bf16.mxu1 %v3896_v11  ;;  %v361_v7 = vld [vmem:[#allocation5 + $0x7e8] sm:$0xff]  ;;  %v3958_v11 = vcombine.high %v356_v3, %v360_v4 }
  0xba   :  { %v405_v63 = vld [vmem:[#allocation5 + $0x948] sm:$0xff] }
  0xbc   :  { %2512 = vmatpush1.bf16.msra.mxu0 %v3893_v13  ;;  %2641 = vmatpush1.bf16.msra.mxu1 %v3895_v14  ;;  %v365_v13 = vld [vmem:[#allocation5 + $0x808] sm:$0xff] }
  0xbd   :  { %2513 = vmatprep.subr.bf16.mxu0 %v3902_v16  ;;  %2642 = vmatprep.subr.bf16.mxu1 %v3904_v20  ;;  %v369_v14 = vld [vmem:[#allocation5 + $0x828] sm:$0xff]  ;;  %v3960_v16 = vcombine.high %v357_v5, %v361_v7  ;;  %v372_v20 = vld [vmem:[#allocation5 + $0x840] sm:$0xff] }
  0xbe   :  { %v3968_v28 = vcombine.high %v365_v13, %v369_v14 }
  0xc0   :  { %2514 = vmatpush1.bf16.msra.mxu0 %v3901_v22  ;;  %2643 = vmatpush1.bf16.msra.mxu1 %v3903_v23  ;;  %v3959_v22 = vcombine.low %v357_v5, %v361_v7  ;;  %v3966_v23 = vcombine.high %v364_v9, %v368_v12  ;;  %v412_v5 = vld [vmem:[#allocation5 + $0x980] sm:$0xff]  ;;  %v413_v7 = vld [vmem:[#allocation5 + $0x988] sm:$0xff] }
  0xc1   :  { %2515 = vmatprep.subr.bf16.mxu0 %v3910_v24  ;;  %2644 = vmatprep.subr.bf16.mxu1 %v3912_v29  ;;  %v373_v24 = vld [vmem:[#allocation5 + $0x848] sm:$0xff]  ;;  %v101_v29 = vld [vmem:[#allocation3 + $0x58] sm:$0xff] }
  0xc4   :  { %2516 = vmatpush1.bf16.msra.mxu0 %v3909_v31  ;;  %2645 = vmatpush1.bf16.msra.mxu1 %v3911_v32  ;;  %v3965_v31 = vcombine.low %v364_v9, %v368_v12  ;;  %v3967_v32 = vcombine.low %v365_v13, %v369_v14  ;;  %v420_v13 = vld [vmem:[#allocation5 + $0x9c0] sm:$0xff] }
  0xc5   :  { %2517 = vmatprep.subr.bf16.mxu0 %v3918_v33  ;;  %2646 = vmatprep.subr.bf16.mxu1 %v3920_v37  ;;  %v3974_v33 = vcombine.high %v372_v20, %v376_v21  ;;  %v3976_v37 = vcombine.high %v373_v24, %v377_v26  ;;  %v424_v14 = vld [vmem:[#allocation5 + $0x9e0] sm:$0xff] }
  0xc8   :  { %2518 = vmatpush1.bf16.msra.mxu0 %v3917_v39  ;;  %2647 = vmatpush1.bf16.msra.mxu1 %v3919_v40  ;;  %v4607_v39 = vpack.c.bf16 %v101_v29, %v95_v27  ;;  %v3973_v40 = vcombine.low %v372_v20, %v376_v21  ;;  %v4022_v20 = vcombine.high %v420_v13, %v424_v14 }
  0xc9   :  { %2519 = vmatprep.subr.bf16.mxu0 %v3926_v41  ;;  %2648 = vmatprep.subr.bf16.mxu1 %v3928_v45  ;;  %v3975_v41 = vcombine.low %v373_v24, %v377_v26  ;;  %v392_v45 = vld [vmem:[#allocation5 + $0x8e0] sm:$0xff]  ;;  %v429_v24 = vld [vmem:[#allocation5 + $0xa08] sm:$0xff]  ;;  %v4021_v27 = vcombine.low %v420_v13, %v424_v14 }
  0xca   :  { %v3990_v50 = vcombine.high %v388_v44, %v392_v45  ;;  %v433_v26 = vld [vmem:[#allocation5 + $0xa28] sm:$0xff] }
  0xcb   :  { %v481_v13 = vld [vmem:[#allocation5 + $0xba8] sm:$0xff] }
  0xcc   :  { %2520 = vmatpush1.bf16.msra.mxu0 %v3925_v47  ;;  %2649 = vmatpush1.bf16.msra.mxu1 %v3927_v48  ;;  %v393_v47 = vld [vmem:[#allocation5 + $0x8e8] sm:$0xff]  ;;  %v3981_v48 = vcombine.low %v380_v34, %v384_v35 }
  0xcd   :  { %2521 = vmatprep.subr.bf16.mxu0 %v3934_v49  ;;  %2650 = vmatprep.subr.bf16.mxu1 %v3936_v53  ;;  %v3983_v49 = vcombine.low %v381_v36, %v385_v38  ;;  %v3992_v51 = vcombine.high %v389_v46, %v393_v47  ;;  %v400_v53 = vld [vmem:[#allocation5 + $0x920] sm:$0xff]  ;;  %v437_v34 = vld [vmem:[#allocation5 + $0xa48] sm:$0xff] }
  0xce   :  { %v3998_v59 = vcombine.high %v396_v52, %v400_v53  ;;  %v441_v35 = vld [vmem:[#allocation5 + $0xa68] sm:$0xff] }
  0xd0   :  { %2522 = vmatpush1.bf16.msra.mxu0 %v3933_v55  ;;  %2651 = vmatpush1.bf16.msra.mxu1 %v3935_v56  ;;  %v401_v55 = vld [vmem:[#allocation5 + $0x928] sm:$0xff]  ;;  %v3989_v56 = vcombine.low %v388_v44, %v392_v45 }
  0xd1   :  { %2523 = vmatprep.subr.bf16.mxu0 %v3942_v57  ;;  %2652 = vmatprep.subr.bf16.mxu1 %v3944_v62  ;;  %v3991_v57 = vcombine.low %v389_v46, %v393_v47  ;;  %v4000_v60 = vcombine.high %v397_v54, %v401_v55  ;;  %v408_v62 = vld [vmem:[#allocation5 + $0x960] sm:$0xff]  ;;  %v449_v44 = vld [vmem:[#allocation5 + $0xaa8] sm:$0xff]  ;;  %v4039_v46 = vcombine.low %v437_v34, %v441_v35 }
  0xd2   :  { %v4006_v3 = vcombine.high %v404_v61, %v408_v62  ;;  %v4005_v9 = vcombine.low %v404_v61, %v408_v62  ;;  %v465_v61 = vld [vmem:[#allocation5 + $0xb28] sm:$0xff] }
  0xd4   :  { %2524 = vmatpush1.bf16.msra.mxu0 %v3941_v0  ;;  %2653 = vmatpush1.bf16.msra.mxu1 %v3943_v1  ;;  %v409_v0 = vld [vmem:[#allocation5 + $0x968] sm:$0xff]  ;;  %v3997_v1 = vcombine.low %v396_v52, %v400_v53 }
  0xd5   :  { %2525 = vmatprep.subr.bf16.mxu0 %v3950_v2  ;;  %2654 = vmatprep.subr.bf16.mxu1 %v3952_v6  ;;  %v3999_v2 = vcombine.low %v397_v54, %v401_v55  ;;  %v4008_v4 = vcombine.high %v405_v63, %v409_v0  ;;  %v416_v6 = vld [vmem:[#allocation5 + $0x9a0] sm:$0xff]  ;;  %v457_v52 = vld [vmem:[#allocation5 + $0xae8] sm:$0xff] }
  0xd6   :  { %v4013_v18 = vcombine.low %v412_v5, %v416_v6 }
  0xd8   :  { %2526 = vmatpush1.bf16.msra.mxu0 %v3949_v8  ;;  %2655 = vmatpush1.bf16.msra.mxu1 %v3951_v10  ;;  %v417_v8 = vld [vmem:[#allocation5 + $0x9a8] sm:$0xff]  ;;  %v4007_v10 = vcombine.low %v405_v63, %v409_v0 }
  0xd9   :  { %2527 = vmatprep.subr.bf16.mxu0 %v3958_v11  ;;  %2656 = vmatprep.subr.bf16.mxu1 %v3960_v16  ;;  %v4014_v11 = vcombine.high %v412_v5, %v416_v6  ;;  %v4016_v12 = vcombine.high %v413_v7, %v417_v8  ;;  %v421_v16 = vld [vmem:[#allocation5 + $0x9c8] sm:$0xff] }
  0xda   :  { %v4024_v21 = vcombine.high %v421_v16, %v425_v17  ;;  %v473_v5 = vld [vmem:[#allocation5 + $0xb68] sm:$0xff] }
  0xdc   :  { %2528 = vmatpush1.bf16.msra.mxu0 %v3957_v19  ;;  %2657 = vmatpush1.bf16.msra.mxu1 %v3959_v22  ;;  %v4015_v19 = vcombine.low %v413_v7, %v417_v8  ;;  %v428_v22 = vld [vmem:[#allocation5 + $0xa00] sm:$0xff] }
  0xdd   :  { %2540 = vmatprep.subr.bf16.mxu0 %v3966_v23  ;;  %2669 = vmatprep.subr.bf16.mxu1 %v3968_v28  ;;  %v432_v23 = vld [vmem:[#allocation5 + $0xa20] sm:$0xff]  ;;  %v4023_v28 = vcombine.low %v421_v16, %v425_v17 }
  0xde   :  { %v4030_v29 = vcombine.high %v428_v22, %v432_v23  ;;  %v4029_v36 = vcombine.low %v428_v22, %v432_v23  ;;  %v489_v22 = vld [vmem:[#allocation5 + $0xbe8] sm:$0xff] }
  0xdf   :  { %2530 = vmatmul.mubr.bf16.vlgmr.msra.gmra.mrb[0].mxu0 %v4605_v30  ;;  %2659 = vmatmul.mubr.bf16.vlgmr.msra.gmra.mrb[0].mxu1 %v4605_v30 }
  0xe0   :  { %2541 = vmatpush1.bf16.msra.mxu0 %v3965_v31  ;;  %2670 = vmatpush1.bf16.msra.mxu1 %v3967_v32  ;;  %v4032_v31 = vcombine.high %v429_v24, %v433_v26  ;;  %v436_v32 = vld [vmem:[#allocation5 + $0xa40] sm:$0xff] }
  0xe1   :  { %2542 = vmatprep.subr.bf16.mxu0 %v3974_v33  ;;  %2671 = vmatprep.subr.bf16.mxu1 %v3976_v37  ;;  %v440_v33 = vld [vmem:[#allocation5 + $0xa60] sm:$0xff]  ;;  %v4031_v37 = vcombine.low %v429_v24, %v433_v26 }
  0xe2   :  { %2572 = vmatprep.mubr.bf16.mxu0 %v4607_v39  ;;  %2701 = vmatprep.mubr.bf16.mxu1 %v4607_v39  ;;  %v4038_v38 = vcombine.high %v436_v32, %v440_v33  ;;  %v4037_v45 = vcombine.low %v436_v32, %v440_v33  ;;  %v115_v32 = vld [vmem:[#allocation5 + $0x38] sm:$0xff] }
  0xe4   :  { %2543 = vmatpush1.bf16.msra.mxu0 %v3973_v40  ;;  %2672 = vmatpush1.bf16.msra.mxu1 %v3975_v41  ;;  %v4040_v40 = vcombine.high %v437_v34, %v441_v35  ;;  %v444_v41 = vld [vmem:[#allocation5 + $0xa80] sm:$0xff]  ;;  %v100_v35 = vld [vmem:[#allocation3 + $0x50] sm:$0xff] }
  0xe5   :  { %2544 = vmatprep.subr.bf16.mxu0 %v3982_v42  ;;  %2673 = vmatprep.subr.bf16.mxu1 %v3984_v43  ;;  %v448_v42 = vld [vmem:[#allocation5 + $0xaa0] sm:$0xff]  ;;  %v445_v43 = vld [vmem:[#allocation5 + $0xa88] sm:$0xff] }
  0xe6   :  { %v4046_v47 = vcombine.high %v444_v41, %v448_v42  ;;  %v4045_v53 = vcombine.low %v444_v41, %v448_v42  ;;  %v4047_v54 = vcombine.low %v445_v43, %v449_v44  ;;  %v94_v34 = vld [vmem:[#allocation3 + $0x20] sm:$0xff]  ;;  %v122_v41 = vld [vmem:[#allocation5 + $0x70] sm:$0xff] }
  0xe7   :  { %v4613_v42 = vpack.c.bf16 %v100_v35, %v94_v34 }
  0xe8   :  { %2545 = vmatpush1.bf16.msra.mxu0 %v3981_v48  ;;  %2674 = vmatpush1.bf16.msra.mxu1 %v3983_v49  ;;  %v4048_v48 = vcombine.high %v445_v43, %v449_v44  ;;  %v452_v49 = vld [vmem:[#allocation5 + $0xac0] sm:$0xff]  ;;  %v119_v43 = vld [vmem:[#allocation5 + $0x58] sm:$0xff] }
  0xe9   :  { %2546 = vmatprep.subr.bf16.mxu0 %v3990_v50  ;;  %2675 = vmatprep.subr.bf16.mxu1 %v3992_v51  ;;  %v456_v50 = vld [vmem:[#allocation5 + $0xae0] sm:$0xff]  ;;  %v453_v51 = vld [vmem:[#allocation5 + $0xac8] sm:$0xff]  ;;  %v123_v44 = vld [vmem:[#allocation5 + $0x78] sm:$0xff] }
  0xea   :  { %v4054_v55 = vcombine.high %v452_v49, %v456_v50  ;;  %v4053_v62 = vcombine.low %v452_v49, %v456_v50  ;;  %v4055_v63 = vcombine.low %v453_v51, %v457_v52  ;;  %v126_v49 = vld [vmem:[#allocation5 + $0x90] sm:$0xff] }
  0xeb   :  { %v130_v50 = vld [vmem:[#allocation5 + $0xb0] sm:$0xff] }
  0xec   :  { %2547 = vmatpush1.bf16.msra.mxu0 %v3989_v56  ;;  %2676 = vmatpush1.bf16.msra.mxu1 %v3991_v57  ;;  %v4056_v56 = vcombine.high %v453_v51, %v457_v52  ;;  %v460_v57 = vld [vmem:[#allocation5 + $0xb00] sm:$0xff]  ;;  %v127_v51 = vld [vmem:[#allocation5 + $0x98] sm:$0xff] }
  0xed   :  { %2548 = vmatprep.subr.bf16.mxu0 %v3998_v59  ;;  %2677 = vmatprep.subr.bf16.mxu1 %v4000_v60  ;;  %v464_v59 = vld [vmem:[#allocation5 + $0xb20] sm:$0xff]  ;;  %v461_v60 = vld [vmem:[#allocation5 + $0xb08] sm:$0xff]  ;;  %v131_v52 = vld [vmem:[#allocation5 + $0xb8] sm:$0xff] }
  0xee   :  { %v4062_v0 = vcombine.high %v460_v57, %v464_v59  ;;  %v4061_v6 = vcombine.low %v460_v57, %v464_v59  ;;  %v4063_v7 = vcombine.low %v461_v60, %v465_v61  ;;  %v134_v57 = vld [vmem:[#allocation5 + $0xd0] sm:$0xff] }
  0xef   :  { %v138_v59 = vld [vmem:[#allocation5 + $0xf0] sm:$0xff] }
  0xf0   :  { %2549 = vmatpush1.bf16.msra.mxu0 %v3997_v1  ;;  %2678 = vmatpush1.bf16.msra.mxu1 %v3999_v2  ;;  %v4064_v1 = vcombine.high %v461_v60, %v465_v61  ;;  %v468_v2 = vld [vmem:[#allocation5 + $0xb40] sm:$0xff]  ;;  %v135_v60 = vld [vmem:[#allocation5 + $0xd8] sm:$0xff] }
  0xf1   :  { %2550 = vmatprep.subr.bf16.mxu0 %v4006_v3  ;;  %2679 = vmatprep.subr.bf16.mxu1 %v4008_v4  ;;  %v472_v3 = vld [vmem:[#allocation5 + $0xb60] sm:$0xff]  ;;  %v469_v4 = vld [vmem:[#allocation5 + $0xb48] sm:$0xff]  ;;  %v139_v61 = vld [vmem:[#allocation5 + $0xf8] sm:$0xff] }
  0xf2   :  { %v4070_v8 = vcombine.high %v468_v2, %v472_v3  ;;  %v4069_v14 = vcombine.low %v468_v2, %v472_v3  ;;  %v4071_v16 = vcombine.low %v469_v4, %v473_v5  ;;  %v142_v2 = vld [vmem:[#allocation5 + $0x110] sm:$0xff] }
  0xf3   :  { %v146_v3 = vld [vmem:[#allocation5 + $0x130] sm:$0xff] }
  0xf4   :  { %2551 = vmatpush1.bf16.msra.mxu0 %v4005_v9  ;;  %2680 = vmatpush1.bf16.msra.mxu1 %v4007_v10  ;;  %v4072_v9 = vcombine.high %v469_v4, %v473_v5  ;;  %v476_v10 = vld [vmem:[#allocation5 + $0xb80] sm:$0xff]  ;;  %v143_v4 = vld [vmem:[#allocation5 + $0x118] sm:$0xff] }
  0xf5   :  { %2552 = vmatprep.subr.bf16.mxu0 %v4014_v11  ;;  %2681 = vmatprep.subr.bf16.mxu1 %v4016_v12  ;;  %v480_v11 = vld [vmem:[#allocation5 + $0xba0] sm:$0xff]  ;;  %v477_v12 = vld [vmem:[#allocation5 + $0xb88] sm:$0xff]  ;;  %v147_v5 = vld [vmem:[#allocation5 + $0x138] sm:$0xff] }
  0xf6   :  { %v4078_v17 = vcombine.high %v476_v10, %v480_v11  ;;  %v4077_v23 = vcombine.low %v476_v10, %v480_v11  ;;  %v4079_v24 = vcombine.low %v477_v12, %v481_v13  ;;  %v154_v10 = vld [vmem:[#allocation5 + $0x170] sm:$0xff]  ;;  %v151_v11 = vld [vmem:[#allocation5 + $0x158] sm:$0xff] }
  0xf8   :  { %2553 = vmatpush1.bf16.msra.mxu0 %v4013_v18  ;;  %2682 = vmatpush1.bf16.msra.mxu1 %v4015_v19  ;;  %v4080_v18 = vcombine.high %v477_v12, %v481_v13  ;;  %v484_v19 = vld [vmem:[#allocation5 + $0xbc0] sm:$0xff]  ;;  %v155_v12 = vld [vmem:[#allocation5 + $0x178] sm:$0xff]  ;;  %v3745_v13 = vcombine.low %v142_v2, %v146_v3 }
  0xf9   :  { %2554 = vmatprep.subr.bf16.mxu0 %v4022_v20  ;;  %2683 = vmatprep.subr.bf16.mxu1 %v4024_v21  ;;  %v488_v20 = vld [vmem:[#allocation5 + $0xbe0] sm:$0xff]  ;;  %v485_v21 = vld [vmem:[#allocation5 + $0xbc8] sm:$0xff] }
  0xfa   :  { %v4086_v26 = vcombine.high %v484_v19, %v488_v20  ;;  %v4085_v33 = vcombine.low %v484_v19, %v488_v20  ;;  %v162_v19 = vld [vmem:[#allocation5 + $0x1b0] sm:$0xff]  ;;  %v159_v20 = vld [vmem:[#allocation5 + $0x198] sm:$0xff] }
  0xfc   :  { %2555 = vmatpush1.bf16.msra.mxu0 %v4021_v27  ;;  %2684 = vmatpush1.bf16.msra.mxu1 %v4023_v28  ;;  %v4088_v27 = vcombine.high %v485_v21, %v489_v22  ;;  %v110_v28 = vld [vmem:[#allocation5 + $0x10] sm:$0xff] }
  0xfd   :  { %2556 = vmatprep.subr.bf16.mxu0 %v4030_v29  ;;  %2685 = vmatprep.subr.bf16.mxu1 %v4032_v31  ;;  %v114_v29 = vld [vmem:[#allocation5 + $0x30] sm:$0xff]  ;;  %v111_v31 = vld [vmem:[#allocation5 + $0x18] sm:$0xff] }
 0x100   :  { %2557 = vmatpush1.bf16.msra.mxu0 %v4029_v36  ;;  %2686 = vmatpush1.bf16.msra.mxu1 %v4031_v37  ;;  %v4087_v36 = vcombine.low %v485_v21, %v489_v22  ;;  %v3714_v37 = vcombine.high %v110_v28, %v114_v29  ;;  %v163_v21 = vld [vmem:[#allocation5 + $0x1b8] sm:$0xff] }
 0x101   :  { %2558 = vmatprep.subr.bf16.mxu0 %v4038_v38  ;;  %2687 = vmatprep.subr.bf16.mxu1 %v4040_v40  ;;  %v3716_v38 = vcombine.high %v111_v31, %v115_v32  ;;  %v118_v40 = vld [vmem:[#allocation5 + $0x50] sm:$0xff] }
 0x104   :  { %2559 = vmatpush1.bf16.msra.mxu0 %v4037_v45  ;;  %2688 = vmatpush1.bf16.msra.mxu1 %v4039_v46  ;;  %v3713_v45 = vcombine.low %v110_v28, %v114_v29  ;;  %v3715_v46 = vcombine.low %v111_v31, %v115_v32  ;;  %v170_v28 = vld [vmem:[#allocation5 + $0x1f0] sm:$0xff]  ;;  %v167_v29 = vld [vmem:[#allocation5 + $0x1d8] sm:$0xff] }
 0x105   :  { %2560 = vmatprep.subr.bf16.mxu0 %v4046_v47  ;;  %2689 = vmatprep.subr.bf16.mxu1 %v4048_v48  ;;  %v3722_v47 = vcombine.high %v118_v40, %v122_v41  ;;  %v3724_v48 = vcombine.high %v119_v43, %v123_v44  ;;  %v171_v31 = vld [vmem:[#allocation5 + $0x1f8] sm:$0xff] }
 0x106   :  { %v3772_v35 = vcombine.high %v167_v29, %v171_v31 }
 0x108   :  { %2561 = vmatpush1.bf16.msra.mxu0 %v4045_v53  ;;  %2690 = vmatpush1.bf16.msra.mxu1 %v4047_v54  ;;  %v3721_v53 = vcombine.low %v118_v40, %v122_v41  ;;  %v3723_v54 = vcombine.low %v119_v43, %v123_v44  ;;  %v179_v40 = vld [vmem:[#allocation5 + $0x238] sm:$0xff]  ;;  %v3771_v43 = vcombine.low %v167_v29, %v171_v31 }
 0x109   :  { %2562 = vmatprep.subr.bf16.mxu0 %v4054_v55  ;;  %2691 = vmatprep.subr.bf16.mxu1 %v4056_v56  ;;  %v3730_v55 = vcombine.high %v126_v49, %v130_v50  ;;  %v3732_v56 = vcombine.high %v127_v51, %v131_v52 }
 0x10c   :  { %2563 = vmatpush1.bf16.msra.mxu0 %v4053_v62  ;;  %2692 = vmatpush1.bf16.msra.mxu1 %v4055_v63  ;;  %v3729_v62 = vcombine.low %v126_v49, %v130_v50  ;;  %v3731_v63 = vcombine.low %v127_v51, %v131_v52  ;;  %v187_v49 = vld [vmem:[#allocation5 + $0x278] sm:$0xff] }
 0x10d   :  { %2564 = vmatprep.subr.bf16.mxu0 %v4062_v0  ;;  %2693 = vmatprep.subr.bf16.mxu1 %v4064_v1  ;;  %v3738_v0 = vcombine.high %v134_v57, %v138_v59  ;;  %v3740_v1 = vcombine.high %v135_v60, %v139_v61 }
 0x110   :  { %2565 = vmatpush1.bf16.msra.mxu0 %v4061_v6  ;;  %2694 = vmatpush1.bf16.msra.mxu1 %v4063_v7  ;;  %v3737_v6 = vcombine.low %v134_v57, %v138_v59  ;;  %v3739_v7 = vcombine.low %v135_v60, %v139_v61  ;;  %v195_v57 = vld [vmem:[#allocation5 + $0x2b8] sm:$0xff] }
 0x111   :  { %2566 = vmatprep.subr.bf16.mxu0 %v4070_v8  ;;  %2695 = vmatprep.subr.bf16.mxu1 %v4072_v9  ;;  %v3746_v8 = vcombine.high %v142_v2, %v146_v3  ;;  %v150_v9 = vld [vmem:[#allocation5 + $0x150] sm:$0xff]  ;;  %v203_v2 = vld [vmem:[#allocation5 + $0x2f8] sm:$0xff] }
 0x112   :  { %v3753_v22 = vcombine.low %v150_v9, %v154_v10 }
 0x114   :  { %2567 = vmatpush1.bf16.msra.mxu0 %v4069_v14  ;;  %2696 = vmatpush1.bf16.msra.mxu1 %v4071_v16  ;;  %v3747_v14 = vcombine.low %v143_v4, %v147_v5  ;;  %v3754_v16 = vcombine.high %v150_v9, %v154_v10  ;;  %v211_v9 = vld [vmem:[#allocation5 + $0x338] sm:$0xff] }
 0x115   :  { %2568 = vmatprep.subr.bf16.mxu0 %v4078_v17  ;;  %2697 = vmatprep.subr.bf16.mxu1 %v4080_v18  ;;  %v3756_v17 = vcombine.high %v151_v11, %v155_v12  ;;  %v158_v18 = vld [vmem:[#allocation5 + $0x190] sm:$0xff] }
 0x116   :  { %v3761_v32 = vcombine.low %v158_v18, %v162_v19 }
 0x118   :  { %2569 = vmatpush1.bf16.msra.mxu0 %v4077_v23  ;;  %2698 = vmatpush1.bf16.msra.mxu1 %v4079_v24  ;;  %v3755_v23 = vcombine.low %v151_v11, %v155_v12  ;;  %v3762_v24 = vcombine.high %v158_v18, %v162_v19  ;;  %v219_v18 = vld [vmem:[#allocation5 + $0x378] sm:$0xff] }
 0x119   :  { %2570 = vmatprep.subr.bf16.mxu0 %v4086_v26  ;;  %2699 = vmatprep.subr.bf16.mxu1 %v4088_v27  ;;  %v3764_v26 = vcombine.high %v159_v20, %v163_v21  ;;  %v166_v27 = vld [vmem:[#allocation5 + $0x1d0] sm:$0xff] }
 0x11a   :  { %v3770_v34 = vcombine.high %v166_v27, %v170_v28  ;;  %v3769_v41 = vcombine.low %v166_v27, %v170_v28  ;;  %v227_v27 = vld [vmem:[#allocation5 + $0x3b8] sm:$0xff] }
 0x11c   :  { %2571 = vmatpush1.bf16.msra.mxu0 %v4085_v33  ;;  %2700 = vmatpush1.bf16.msra.mxu1 %v4087_v36  ;;  %v3763_v33 = vcombine.low %v159_v20, %v163_v21  ;;  %v174_v36 = vld [vmem:[#allocation5 + $0x210] sm:$0xff] }
 0x11d   :  { %2712 = vmatprep.subr.bf16.mxu0 %v3714_v37  ;;  %2841 = vmatprep.subr.bf16.mxu1 %v3716_v38  ;;  %v178_v37 = vld [vmem:[#allocation5 + $0x230] sm:$0xff]  ;;  %v175_v38 = vld [vmem:[#allocation5 + $0x218] sm:$0xff] }
 0x11e   :  { %v3778_v44 = vcombine.high %v174_v36, %v178_v37  ;;  %v3777_v50 = vcombine.low %v174_v36, %v178_v37  ;;  %v3779_v51 = vcombine.low %v175_v38, %v179_v40  ;;  %v235_v36 = vld [vmem:[#allocation5 + $0x3f8] sm:$0xff] }
 0x11f   :  { %2573 = vmatmul.mubr.bf16.vlgmr.msra.gmra.mrb[0].mxu0 %v4613_v42  ;;  %2702 = vmatmul.mubr.bf16.vlgmr.msra.gmra.mrb[0].mxu1 %v4613_v42 }
 0x120   :  { %2713 = vmatpush1.bf16.msra.mxu0 %v3713_v45  ;;  %2842 = vmatpush1.bf16.msra.mxu1 %v3715_v46  ;;  %v3780_v45 = vcombine.high %v175_v38, %v179_v40  ;;  %v182_v46 = vld [vmem:[#allocation5 + $0x250] sm:$0xff] }
 0x121   :  { %2714 = vmatprep.subr.bf16.mxu0 %v3722_v47  ;;  %2843 = vmatprep.subr.bf16.mxu1 %v3724_v48  ;;  %v186_v47 = vld [vmem:[#allocation5 + $0x270] sm:$0xff]  ;;  %v183_v48 = vld [vmem:[#allocation5 + $0x258] sm:$0xff] }
 0x122   :  { %2744 = vmatprep.mubr.bf16.mxu0 %v4593_v58  ;;  %2873 = vmatprep.mubr.bf16.mxu1 %v4593_v58  ;;  %v3748_v58 = vcombine.high %v143_v4, %v147_v5  ;;  %v3786_v52 = vcombine.high %v182_v46, %v186_v47  ;;  %v3785_v59 = vcombine.low %v182_v46, %v186_v47  ;;  %v243_v46 = vld [vmem:[#allocation5 + $0x438] sm:$0xff] }
 0x123   :  { %v3787_v60 = vcombine.low %v183_v48, %v187_v49 }
 0x124   :  { %2715 = vmatpush1.bf16.msra.mxu0 %v3721_v53  ;;  %2844 = vmatpush1.bf16.msra.mxu1 %v3723_v54  ;;  %v3788_v53 = vcombine.high %v183_v48, %v187_v49  ;;  %v190_v54 = vld [vmem:[#allocation5 + $0x290] sm:$0xff] }
 0x125   :  { %2716 = vmatprep.subr.bf16.mxu0 %v3730_v55  ;;  %2845 = vmatprep.subr.bf16.mxu1 %v3732_v56  ;;  %v194_v55 = vld [vmem:[#allocation5 + $0x2b0] sm:$0xff]  ;;  %v191_v56 = vld [vmem:[#allocation5 + $0x298] sm:$0xff] }
 0x126   :  { %v3794_v61 = vcombine.high %v190_v54, %v194_v55  ;;  %v3793_v3 = vcombine.low %v190_v54, %v194_v55  ;;  %v3795_v4 = vcombine.low %v191_v56, %v195_v57  ;;  %v251_v54 = vld [vmem:[#allocation5 + $0x478] sm:$0xff] }
 0x128   :  { %2717 = vmatpush1.bf16.msra.mxu0 %v3729_v62  ;;  %2846 = vmatpush1.bf16.msra.mxu1 %v3731_v63  ;;  %v3796_v62 = vcombine.high %v191_v56, %v195_v57  ;;  %v198_v63 = vld [vmem:[#allocation5 + $0x2d0] sm:$0xff] }
 0x129   :  { %2718 = vmatprep.subr.bf16.mxu0 %v3738_v0  ;;  %2847 = vmatprep.subr.bf16.mxu1 %v3740_v1  ;;  %v202_v0 = vld [vmem:[#allocation5 + $0x2f0] sm:$0xff]  ;;  %v199_v1 = vld [vmem:[#allocation5 + $0x2d8] sm:$0xff] }
 0x12a   :  { %v3802_v5 = vcombine.high %v198_v63, %v202_v0  ;;  %v3801_v10 = vcombine.low %v198_v63, %v202_v0  ;;  %v3803_v11 = vcombine.low %v199_v1, %v203_v2  ;;  %v259_v63 = vld [vmem:[#allocation5 + $0x4b8] sm:$0xff] }
 0x12c   :  { %2719 = vmatpush1.bf16.msra.mxu0 %v3737_v6  ;;  %2848 = vmatpush1.bf16.msra.mxu1 %v3739_v7  ;;  %v3804_v6 = vcombine.high %v199_v1, %v203_v2  ;;  %v206_v7 = vld [vmem:[#allocation5 + $0x310] sm:$0xff] }
 0x12d   :  { %2720 = vmatprep.subr.bf16.mxu0 %v3746_v8  ;;  %2849 = vmatprep.subr.bf16.mxu1 %v3748_v58  ;;  %v210_v8 = vld [vmem:[#allocation5 + $0x330] sm:$0xff]  ;;  %v207_v58 = vld [vmem:[#allocation5 + $0x318] sm:$0xff] }
 0x12e   :  { %v3810_v12 = vcombine.high %v206_v7, %v210_v8  ;;  %v3809_v19 = vcombine.low %v206_v7, %v210_v8  ;;  %v3811_v20 = vcombine.low %v207_v58, %v211_v9  ;;  %v267_v7 = vld [vmem:[#allocation5 + $0x4f8] sm:$0xff] }
 0x130   :  { %2721 = vmatpush1.bf16.msra.mxu0 %v3745_v13  ;;  %2850 = vmatpush1.bf16.msra.mxu1 %v3747_v14  ;;  %v3812_v13 = vcombine.high %v207_v58, %v211_v9  ;;  %v214_v14 = vld [vmem:[#allocation5 + $0x350] sm:$0xff] }
 0x131   :  { %2722 = vmatprep.subr.bf16.mxu0 %v3754_v16  ;;  %2851 = vmatprep.subr.bf16.mxu1 %v3756_v17  ;;  %v218_v16 = vld [vmem:[#allocation5 + $0x370] sm:$0xff]  ;;  %v215_v17 = vld [vmem:[#allocation5 + $0x358] sm:$0xff] }
 0x132   :  { %v3818_v21 = vcombine.high %v214_v14, %v218_v16  ;;  %v3817_v28 = vcombine.low %v214_v14, %v218_v16  ;;  %v3819_v29 = vcombine.low %v215_v17, %v219_v18 }
 0x134   :  { %2723 = vmatpush1.bf16.msra.mxu0 %v3753_v22  ;;  %2852 = vmatpush1.bf16.msra.mxu1 %v3755_v23  ;;  %v3820_v22 = vcombine.high %v215_v17, %v219_v18  ;;  %v222_v23 = vld [vmem:[#allocation5 + $0x390] sm:$0xff] }
 0x135   :  { %2724 = vmatprep.subr.bf16.mxu0 %v3762_v24  ;;  %2853 = vmatprep.subr.bf16.mxu1 %v3764_v26  ;;  %v226_v24 = vld [vmem:[#allocation5 + $0x3b0] sm:$0xff]  ;;  %v223_v26 = vld [vmem:[#allocation5 + $0x398] sm:$0xff] }
 0x136   :  { %v3826_v31 = vcombine.high %v222_v23, %v226_v24  ;;  %v3825_v37 = vcombine.low %v222_v23, %v226_v24  ;;  %v3827_v38 = vcombine.low %v223_v26, %v227_v27  ;;  %v278_v18 = vld [vmem:[#allocation5 + $0x550] sm:$0xff] }
 0x138   :  { %2725 = vmatpush1.bf16.msra.mxu0 %v3761_v32  ;;  %2854 = vmatpush1.bf16.msra.mxu1 %v3763_v33  ;;  %v3828_v32 = vcombine.high %v223_v26, %v227_v27  ;;  %v230_v33 = vld [vmem:[#allocation5 + $0x3d0] sm:$0xff] }
 0x139   :  { %2726 = vmatprep.subr.bf16.mxu0 %v3770_v34  ;;  %2855 = vmatprep.subr.bf16.mxu1 %v3772_v35  ;;  %v234_v34 = vld [vmem:[#allocation5 + $0x3f0] sm:$0xff]  ;;  %v231_v35 = vld [vmem:[#allocation5 + $0x3d8] sm:$0xff] }
 0x13a   :  { %v3834_v40 = vcombine.high %v230_v33, %v234_v34  ;;  %v3833_v47 = vcombine.low %v230_v33, %v234_v34  ;;  %v3835_v48 = vcombine.low %v231_v35, %v235_v36  ;;  %v286_v27 = vld [vmem:[#allocation5 + $0x590] sm:$0xff] }
 0x13c   :  { %2727 = vmatpush1.bf16.msra.mxu0 %v3769_v41  ;;  %2856 = vmatpush1.bf16.msra.mxu1 %v3771_v43  ;;  %v3836_v41 = vcombine.high %v231_v35, %v235_v36  ;;  %v238_v43 = vld [vmem:[#allocation5 + $0x410] sm:$0xff] }
 0x13d   :  { %2728 = vmatprep.subr.bf16.mxu0 %v3778_v44  ;;  %2857 = vmatprep.subr.bf16.mxu1 %v3780_v45  ;;  %v242_v44 = vld [vmem:[#allocation5 + $0x430] sm:$0xff]  ;;  %v239_v45 = vld [vmem:[#allocation5 + $0x418] sm:$0xff] }
 0x13e   :  { %v3842_v49 = vcombine.high %v238_v43, %v242_v44  ;;  %v3841_v55 = vcombine.low %v238_v43, %v242_v44  ;;  %v3843_v56 = vcombine.low %v239_v45, %v243_v46  ;;  %v294_v36 = vld [vmem:[#allocation5 + $0x5d0] sm:$0xff] }
 0x140   :  { %2729 = vmatpush1.bf16.msra.mxu0 %v3777_v50  ;;  %2858 = vmatpush1.bf16.msra.mxu1 %v3779_v51  ;;  %v3844_v50 = vcombine.high %v239_v45, %v243_v46  ;;  %v246_v51 = vld [vmem:[#allocation5 + $0x450] sm:$0xff] }
 0x141   :  { %2730 = vmatprep.subr.bf16.mxu0 %v3786_v52  ;;  %2859 = vmatprep.subr.bf16.mxu1 %v3788_v53  ;;  %v250_v52 = vld [vmem:[#allocation5 + $0x470] sm:$0xff]  ;;  %v247_v53 = vld [vmem:[#allocation5 + $0x458] sm:$0xff] }
 0x142   :  { %v3850_v57 = vcombine.high %v246_v51, %v250_v52  ;;  %v3849_v0 = vcombine.low %v246_v51, %v250_v52  ;;  %v3851_v1 = vcombine.low %v247_v53, %v251_v54  ;;  %v302_v46 = vld [vmem:[#allocation5 + $0x610] sm:$0xff] }
 0x144   :  { %2731 = vmatpush1.bf16.msra.mxu0 %v3785_v59  ;;  %2860 = vmatpush1.bf16.msra.mxu1 %v3787_v60  ;;  %v3852_v59 = vcombine.high %v247_v53, %v251_v54  ;;  %v254_v60 = vld [vmem:[#allocation5 + $0x490] sm:$0xff] }
 0x145   :  { %2732 = vmatprep.subr.bf16.mxu0 %v3794_v61  ;;  %2861 = vmatprep.subr.bf16.mxu1 %v3796_v62  ;;  %v258_v61 = vld [vmem:[#allocation5 + $0x4b0] sm:$0xff]  ;;  %v255_v62 = vld [vmem:[#allocation5 + $0x498] sm:$0xff] }
 0x146   :  { %v3858_v2 = vcombine.high %v254_v60, %v258_v61  ;;  %v3857_v8 = vcombine.low %v254_v60, %v258_v61  ;;  %v310_v54 = vld [vmem:[#allocation5 + $0x650] sm:$0xff] }
 0x148   :  { %2733 = vmatpush1.bf16.msra.mxu0 %v3793_v3  ;;  %2862 = vmatpush1.bf16.msra.mxu1 %v3795_v4  ;;  %v3860_v3 = vcombine.high %v255_v62, %v259_v63  ;;  %v262_v4 = vld [vmem:[#allocation5 + $0x4d0] sm:$0xff] }
 0x149   :  { %2734 = vmatprep.subr.bf16.mxu0 %v3802_v5  ;;  %2863 = vmatprep.subr.bf16.mxu1 %v3804_v6  ;;  %v266_v5 = vld [vmem:[#allocation5 + $0x4f0] sm:$0xff]  ;;  %v263_v6 = vld [vmem:[#allocation5 + $0x4d8] sm:$0xff] }
 0x14a   :  { %v3866_v58 = vcombine.high %v262_v4, %v266_v5  ;;  %v3868_v9 = vcombine.high %v263_v6, %v267_v7  ;;  %v3865_v14 = vcombine.low %v262_v4, %v266_v5  ;;  %v3867_v16 = vcombine.low %v263_v6, %v267_v7  ;;  %v326_v7 = vld [vmem:[#allocation5 + $0x6d0] sm:$0xff] }
 0x14c   :  { %2735 = vmatpush1.bf16.msra.mxu0 %v3801_v10  ;;  %2864 = vmatpush1.bf16.msra.mxu1 %v3803_v11  ;;  %v270_v10 = vld [vmem:[#allocation5 + $0x510] sm:$0xff] }
 0x14d   :  { %2736 = vmatprep.subr.bf16.mxu0 %v3810_v12  ;;  %2865 = vmatprep.subr.bf16.mxu1 %v3812_v13  ;;  %v274_v11 = vld [vmem:[#allocation5 + $0x530] sm:$0xff]  ;;  %v271_v12 = vld [vmem:[#allocation5 + $0x518] sm:$0xff] }
 0x14e   :  { %v275_v13 = vld [vmem:[#allocation5 + $0x538] sm:$0xff]  ;;  %v3874_v17 = vcombine.high %v270_v10, %v274_v11 }
 0x14f   :  { %v3875_v23 = vcombine.low %v271_v12, %v275_v13 }
 0x150   :  { %2737 = vmatpush1.bf16.msra.mxu0 %v3809_v19  ;;  %2866 = vmatpush1.bf16.msra.mxu1 %v3811_v20  ;;  %v282_v19 = vld [vmem:[#allocation5 + $0x570] sm:$0xff]  ;;  %v279_v20 = vld [vmem:[#allocation5 + $0x558] sm:$0xff] }
 0x151   :  { %2738 = vmatprep.subr.bf16.mxu0 %v3818_v21  ;;  %2867 = vmatprep.subr.bf16.mxu1 %v3820_v22  ;;  %v283_v21 = vld [vmem:[#allocation5 + $0x578] sm:$0xff]  ;;  %v3873_v22 = vcombine.low %v270_v10, %v274_v11  ;;  %v3882_v24 = vcombine.high %v278_v18, %v282_v19 }
 0x152   :  { %v3884_v26 = vcombine.high %v279_v20, %v283_v21  ;;  %v3883_v33 = vcombine.low %v279_v20, %v283_v21  ;;  %v342_v21 = vld [vmem:[#allocation5 + $0x750] sm:$0xff] }
 0x154   :  { %2739 = vmatpush1.bf16.msra.mxu0 %v3817_v28  ;;  %2868 = vmatpush1.bf16.msra.mxu1 %v3819_v29  ;;  %v290_v28 = vld [vmem:[#allocation5 + $0x5b0] sm:$0xff]  ;;  %v287_v29 = vld [vmem:[#allocation5 + $0x598] sm:$0xff] }
 0x155   :  { %2740 = vmatprep.subr.bf16.mxu0 %v3826_v31  ;;  %2869 = vmatprep.subr.bf16.mxu1 %v3828_v32  ;;  %v291_v31 = vld [vmem:[#allocation5 + $0x5b8] sm:$0xff]  ;;  %v3881_v32 = vcombine.low %v278_v18, %v282_v19  ;;  %v3890_v34 = vcombine.high %v286_v27, %v290_v28 }
 0x156   :  { %v3892_v35 = vcombine.high %v287_v29, %v291_v31  ;;  %v3891_v43 = vcombine.low %v287_v29, %v291_v31  ;;  %v350_v31 = vld [vmem:[#allocation5 + $0x790] sm:$0xff] }
 0x158   :  { %2741 = vmatpush1.bf16.msra.mxu0 %v3825_v37  ;;  %2870 = vmatpush1.bf16.msra.mxu1 %v3827_v38  ;;  %v298_v37 = vld [vmem:[#allocation5 + $0x5f0] sm:$0xff]  ;;  %v295_v38 = vld [vmem:[#allocation5 + $0x5d8] sm:$0xff] }
 0x159   :  { %2742 = vmatprep.subr.bf16.mxu0 %v3834_v40  ;;  %2871 = vmatprep.subr.bf16.mxu1 %v3836_v41  ;;  %v299_v40 = vld [vmem:[#allocation5 + $0x5f8] sm:$0xff]  ;;  %v3889_v41 = vcombine.low %v286_v27, %v290_v28  ;;  %v3898_v44 = vcombine.high %v294_v36, %v298_v37 }
 0x15a   :  { %v3900_v45 = vcombine.high %v295_v38, %v299_v40  ;;  %v3899_v51 = vcombine.low %v295_v38, %v299_v40  ;;  %v358_v40 = vld [vmem:[#allocation5 + $0x7d0] sm:$0xff] }
 0x15c   :  { %2743 = vmatpush1.bf16.msra.mxu0 %v3833_v47  ;;  %2872 = vmatpush1.bf16.msra.mxu1 %v3835_v48  ;;  %v306_v47 = vld [vmem:[#allocation5 + $0x630] sm:$0xff]  ;;  %v303_v48 = vld [vmem:[#allocation5 + $0x618] sm:$0xff] }
 0x15d   :  { %2755 = vmatprep.subr.bf16.mxu0 %v3842_v49  ;;  %2884 = vmatprep.subr.bf16.mxu1 %v3844_v50  ;;  %v307_v49 = vld [vmem:[#allocation5 + $0x638] sm:$0xff]  ;;  %v3897_v50 = vcombine.low %v294_v36, %v298_v37  ;;  %v3906_v52 = vcombine.high %v302_v46, %v306_v47 }
 0x15e   :  { %v3908_v53 = vcombine.high %v303_v48, %v307_v49  ;;  %v3907_v60 = vcombine.low %v303_v48, %v307_v49  ;;  %v366_v49 = vld [vmem:[#allocation5 + $0x810] sm:$0xff] }
 0x15f   :  { %2745 = vmatmul.mubr.bf16.vlgmr.msra.gmra.mrb[4].mxu0 %v4597_v15  ;;  %2874 = vmatmul.mubr.bf16.vlgmr.msra.gmra.mrb[4].mxu1 %v4597_v15  ;;  %v3859_v15 = vcombine.low %v255_v62, %v259_v63  ;;  %v318_v63 = vld [vmem:[#allocation5 + $0x690] sm:$0xff] }
 0x160   :  { %2756 = vmatpush1.bf16.msra.mxu0 %v3841_v55  ;;  %2885 = vmatpush1.bf16.msra.mxu1 %v3843_v56  ;;  %v314_v55 = vld [vmem:[#allocation5 + $0x670] sm:$0xff]  ;;  %v311_v56 = vld [vmem:[#allocation5 + $0x658] sm:$0xff] }
 0x161   :  { %2757 = vmatprep.subr.bf16.mxu0 %v3850_v57  ;;  %2886 = vmatprep.subr.bf16.mxu1 %v3852_v59  ;;  %v315_v57 = vld [vmem:[#allocation5 + $0x678] sm:$0xff]  ;;  %v3905_v59 = vcombine.low %v302_v46, %v306_v47  ;;  %v3914_v61 = vcombine.high %v310_v54, %v314_v55 }
 0x162   :  { %2787 = vmatprep.mubr.bf16.mxu0 %v4599_v25  ;;  %2916 = vmatprep.mubr.bf16.mxu1 %v4599_v25  ;;  %v3876_v25 = vcombine.high %v271_v12, %v275_v13  ;;  %v3916_v62 = vcombine.high %v311_v56, %v315_v57  ;;  %v3915_v4 = vcombine.low %v311_v56, %v315_v57  ;;  %v334_v13 = vld [vmem:[#allocation5 + $0x710] sm:$0xff] }
 0x163   :  { %v374_v57 = vld [vmem:[#allocation5 + $0x850] sm:$0xff] }
 0x164   :  { %2758 = vmatpush1.bf16.msra.mxu0 %v3849_v0  ;;  %2887 = vmatpush1.bf16.msra.mxu1 %v3851_v1  ;;  %v322_v0 = vld [vmem:[#allocation5 + $0x6b0] sm:$0xff]  ;;  %v319_v1 = vld [vmem:[#allocation5 + $0x698] sm:$0xff] }
 0x165   :  { %2759 = vmatprep.subr.bf16.mxu0 %v3858_v2  ;;  %2888 = vmatprep.subr.bf16.mxu1 %v3860_v3  ;;  %v323_v2 = vld [vmem:[#allocation5 + $0x6b8] sm:$0xff]  ;;  %v3913_v3 = vcombine.low %v310_v54, %v314_v55  ;;  %v3922_v5 = vcombine.high %v318_v63, %v322_v0 }
 0x166   :  { %v3924_v6 = vcombine.high %v319_v1, %v323_v2  ;;  %v3923_v10 = vcombine.low %v319_v1, %v323_v2  ;;  %v382_v2 = vld [vmem:[#allocation5 + $0x890] sm:$0xff] }
 0x168   :  { %2760 = vmatpush1.bf16.msra.mxu0 %v3857_v8  ;;  %2889 = vmatpush1.bf16.msra.mxu1 %v3859_v15  ;;  %v330_v8 = vld [vmem:[#allocation5 + $0x6f0] sm:$0xff]  ;;  %v327_v15 = vld [vmem:[#allocation5 + $0x6d8] sm:$0xff] }
 0x169   :  { %2761 = vmatprep.subr.bf16.mxu0 %v3866_v58  ;;  %2890 = vmatprep.subr.bf16.mxu1 %v3868_v9  ;;  %v331_v58 = vld [vmem:[#allocation5 + $0x6f8] sm:$0xff]  ;;  %v3921_v9 = vcombine.low %v318_v63, %v322_v0  ;;  %v3930_v11 = vcombine.high %v326_v7, %v330_v8 }
 0x16a   :  { %v3932_v12 = vcombine.high %v327_v15, %v331_v58  ;;  %v3931_v18 = vcombine.low %v327_v15, %v331_v58  ;;  %v390_v58 = vld [vmem:[#allocation5 + $0x8d0] sm:$0xff] }
 0x16c   :  { %2762 = vmatpush1.bf16.msra.mxu0 %v3865_v14  ;;  %2891 = vmatpush1.bf16.msra.mxu1 %v3867_v16  ;;  %v338_v14 = vld [vmem:[#allocation5 + $0x730] sm:$0xff]  ;;  %v335_v16 = vld [vmem:[#allocation5 + $0x718] sm:$0xff] }
 0x16d   :  { %2763 = vmatprep.subr.bf16.mxu0 %v3874_v17  ;;  %2892 = vmatprep.subr.bf16.mxu1 %v3876_v25  ;;  %v339_v17 = vld [vmem:[#allocation5 + $0x738] sm:$0xff]  ;;  %v3929_v25 = vcombine.low %v326_v7, %v330_v8  ;;  %v3938_v19 = vcombine.high %v334_v13, %v338_v14 }
 0x16e   :  { %v3940_v20 = vcombine.high %v335_v16, %v339_v17  ;;  %v3939_v27 = vcombine.low %v335_v16, %v339_v17  ;;  %v398_v16 = vld [vmem:[#allocation5 + $0x910] sm:$0xff] }
 0x16f   :  { %v402_v17 = vld [vmem:[#allocation5 + $0x930] sm:$0xff] }
 0x170   :  { %2764 = vmatpush1.bf16.msra.mxu0 %v3873_v22  ;;  %2893 = vmatpush1.bf16.msra.mxu1 %v3875_v23  ;;  %v346_v22 = vld [vmem:[#allocation5 + $0x770] sm:$0xff]  ;;  %v343_v23 = vld [vmem:[#allocation5 + $0x758] sm:$0xff] }
 0x171   :  { %2765 = vmatprep.subr.bf16.mxu0 %v3882_v24  ;;  %2894 = vmatprep.subr.bf16.mxu1 %v3884_v26  ;;  %v347_v24 = vld [vmem:[#allocation5 + $0x778] sm:$0xff]  ;;  %v3937_v26 = vcombine.low %v334_v13, %v338_v14  ;;  %v3946_v28 = vcombine.high %v342_v21, %v346_v22 }
 0x172   :  { %v3948_v29 = vcombine.high %v343_v23, %v347_v24  ;;  %v3947_v36 = vcombine.low %v343_v23, %v347_v24  ;;  %v410_v23 = vld [vmem:[#allocation5 + $0x970] sm:$0xff]  ;;  %v407_v24 = vld [vmem:[#allocation5 + $0x958] sm:$0xff] }
 0x174   :  { %2766 = vmatpush1.bf16.msra.mxu0 %v3881_v32  ;;  %2895 = vmatpush1.bf16.msra.mxu1 %v3883_v33  ;;  %v354_v32 = vld [vmem:[#allocation5 + $0x7b0] sm:$0xff]  ;;  %v351_v33 = vld [vmem:[#allocation5 + $0x798] sm:$0xff] }
 0x175   :  { %2767 = vmatprep.subr.bf16.mxu0 %v3890_v34  ;;  %2896 = vmatprep.subr.bf16.mxu1 %v3892_v35  ;;  %v355_v34 = vld [vmem:[#allocation5 + $0x7b8] sm:$0xff]  ;;  %v3945_v35 = vcombine.low %v342_v21, %v346_v22  ;;  %v3954_v37 = vcombine.high %v350_v31, %v354_v32  ;;  %v4002_v21 = vcombine.high %v398_v16, %v402_v17  ;;  %v406_v22 = vld [vmem:[#allocation5 + $0x950] sm:$0xff] }
 0x176   :  { %v3956_v38 = vcombine.high %v351_v33, %v355_v34  ;;  %v3955_v46 = vcombine.low %v351_v33, %v355_v34  ;;  %v418_v33 = vld [vmem:[#allocation5 + $0x9b0] sm:$0xff]  ;;  %v415_v34 = vld [vmem:[#allocation5 + $0x998] sm:$0xff] }
 0x178   :  { %2768 = vmatpush1.bf16.msra.mxu0 %v3889_v41  ;;  %2897 = vmatpush1.bf16.msra.mxu1 %v3891_v43  ;;  %v362_v41 = vld [vmem:[#allocation5 + $0x7f0] sm:$0xff]  ;;  %v359_v43 = vld [vmem:[#allocation5 + $0x7d8] sm:$0xff] }
 0x179   :  { %2769 = vmatprep.subr.bf16.mxu0 %v3898_v44  ;;  %2898 = vmatprep.subr.bf16.mxu1 %v3900_v45  ;;  %v363_v44 = vld [vmem:[#allocation5 + $0x7f8] sm:$0xff]  ;;  %v3953_v45 = vcombine.low %v350_v31, %v354_v32  ;;  %v3962_v47 = vcombine.high %v358_v40, %v362_v41  ;;  %v414_v32 = vld [vmem:[#allocation5 + $0x990] sm:$0xff] }
 0x17a   :  { %v3964_v48 = vcombine.high %v359_v43, %v363_v44  ;;  %v3963_v54 = vcombine.low %v359_v43, %v363_v44  ;;  %v426_v43 = vld [vmem:[#allocation5 + $0x9f0] sm:$0xff]  ;;  %v423_v44 = vld [vmem:[#allocation5 + $0x9d8] sm:$0xff] }
 0x17c   :  { %2770 = vmatpush1.bf16.msra.mxu0 %v3897_v50  ;;  %2899 = vmatpush1.bf16.msra.mxu1 %v3899_v51  ;;  %v370_v50 = vld [vmem:[#allocation5 + $0x830] sm:$0xff]  ;;  %v367_v51 = vld [vmem:[#allocation5 + $0x818] sm:$0xff] }
 0x17d   :  { %2771 = vmatprep.subr.bf16.mxu0 %v3906_v52  ;;  %2900 = vmatprep.subr.bf16.mxu1 %v3908_v53  ;;  %v371_v52 = vld [vmem:[#allocation5 + $0x838] sm:$0xff]  ;;  %v3961_v53 = vcombine.low %v358_v40, %v362_v41  ;;  %v3970_v55 = vcombine.high %v366_v49, %v370_v50  ;;  %v422_v41 = vld [vmem:[#allocation5 + $0x9d0] sm:$0xff] }
 0x17e   :  { %v3972_v56 = vcombine.high %v367_v51, %v371_v52  ;;  %v3971_v63 = vcombine.low %v367_v51, %v371_v52  ;;  %v434_v51 = vld [vmem:[#allocation5 + $0xa30] sm:$0xff]  ;;  %v431_v52 = vld [vmem:[#allocation5 + $0xa18] sm:$0xff] }
 0x180   :  { %2772 = vmatpush1.bf16.msra.mxu0 %v3905_v59  ;;  %2901 = vmatpush1.bf16.msra.mxu1 %v3907_v60  ;;  %v378_v59 = vld [vmem:[#allocation5 + $0x870] sm:$0xff]  ;;  %v375_v60 = vld [vmem:[#allocation5 + $0x858] sm:$0xff] }
 0x181   :  { %2773 = vmatprep.subr.bf16.mxu0 %v3914_v61  ;;  %2902 = vmatprep.subr.bf16.mxu1 %v3916_v62  ;;  %v379_v61 = vld [vmem:[#allocation5 + $0x878] sm:$0xff]  ;;  %v3969_v62 = vcombine.low %v366_v49, %v370_v50  ;;  %v3978_v0 = vcombine.high %v374_v57, %v378_v59  ;;  %v430_v50 = vld [vmem:[#allocation5 + $0xa10] sm:$0xff] }
 0x182   :  { %v3980_v1 = vcombine.high %v375_v60, %v379_v61  ;;  %v3979_v7 = vcombine.low %v375_v60, %v379_v61  ;;  %v442_v60 = vld [vmem:[#allocation5 + $0xa70] sm:$0xff]  ;;  %v439_v61 = vld [vmem:[#allocation5 + $0xa58] sm:$0xff] }
 0x184   :  { %2774 = vmatpush1.bf16.msra.mxu0 %v3913_v3  ;;  %2903 = vmatpush1.bf16.msra.mxu1 %v3915_v4  ;;  %v386_v3 = vld [vmem:[#allocation5 + $0x8b0] sm:$0xff]  ;;  %v383_v4 = vld [vmem:[#allocation5 + $0x898] sm:$0xff] }
 0x185   :  { %2775 = vmatprep.subr.bf16.mxu0 %v3922_v5  ;;  %2904 = vmatprep.subr.bf16.mxu1 %v3924_v6  ;;  %v387_v5 = vld [vmem:[#allocation5 + $0x8b8] sm:$0xff]  ;;  %v3977_v6 = vcombine.low %v374_v57, %v378_v59  ;;  %v3986_v8 = vcombine.high %v382_v2, %v386_v3  ;;  %v438_v59 = vld [vmem:[#allocation5 + $0xa50] sm:$0xff] }
 0x186   :  { %v3988_v15 = vcombine.high %v383_v4, %v387_v5 }
 0x188   :  { %2776 = vmatpush1.bf16.msra.mxu0 %v3921_v9  ;;  %2905 = vmatpush1.bf16.msra.mxu1 %v3923_v10  ;;  %v394_v9 = vld [vmem:[#allocation5 + $0x8f0] sm:$0xff]  ;;  %v391_v10 = vld [vmem:[#allocation5 + $0x8d8] sm:$0xff] }
 0x189   :  { %2777 = vmatprep.subr.bf16.mxu0 %v3930_v11  ;;  %2906 = vmatprep.subr.bf16.mxu1 %v3932_v12  ;;  %v395_v11 = vld [vmem:[#allocation5 + $0x8f8] sm:$0xff]  ;;  %v3985_v12 = vcombine.low %v382_v2, %v386_v3  ;;  %v3994_v13 = vcombine.high %v390_v58, %v394_v9  ;;  %v446_v3 = vld [vmem:[#allocation5 + $0xa90] sm:$0xff] }
 0x18a   :  { %v3996_v14 = vcombine.high %v391_v10, %v395_v11 }
 0x18c   :  { %2778 = vmatpush1.bf16.msra.mxu0 %v3929_v25  ;;  %2907 = vmatpush1.bf16.msra.mxu1 %v3931_v18  ;;  %v399_v25 = vld [vmem:[#allocation5 + $0x918] sm:$0xff] }
 0x18d   :  { %2779 = vmatprep.subr.bf16.mxu0 %v3938_v19  ;;  %2908 = vmatprep.subr.bf16.mxu1 %v3940_v20  ;;  %v403_v18 = vld [vmem:[#allocation5 + $0x938] sm:$0xff]  ;;  %v3993_v19 = vcombine.low %v390_v58, %v394_v9  ;;  %v3995_v20 = vcombine.low %v391_v10, %v395_v11  ;;  %v454_v9 = vld [vmem:[#allocation5 + $0xad0] sm:$0xff] }
 0x18e   :  { %v458_v10 = vld [vmem:[#allocation5 + $0xaf0] sm:$0xff]  ;;  %v455_v11 = vld [vmem:[#allocation5 + $0xad8] sm:$0xff] }
 0x190   :  { %2780 = vmatpush1.bf16.msra.mxu0 %v3937_v26  ;;  %2909 = vmatpush1.bf16.msra.mxu1 %v3939_v27  ;;  %v411_v26 = vld [vmem:[#allocation5 + $0x978] sm:$0xff]  ;;  %v4001_v27 = vcombine.low %v398_v16, %v402_v17  ;;  %v462_v17 = vld [vmem:[#allocation5 + $0xb10] sm:$0xff] }
 0x191   :  { %2781 = vmatprep.subr.bf16.mxu0 %v3946_v28  ;;  %2910 = vmatprep.subr.bf16.mxu1 %v3948_v29  ;;  %v4003_v28 = vcombine.low %v399_v25, %v403_v18  ;;  %v4010_v29 = vcombine.high %v406_v22, %v410_v23  ;;  %v4012_v31 = vcombine.high %v407_v24, %v411_v26 }
 0x194   :  { %2782 = vmatpush1.bf16.msra.mxu0 %v3945_v35  ;;  %2911 = vmatpush1.bf16.msra.mxu1 %v3947_v36  ;;  %v419_v35 = vld [vmem:[#allocation5 + $0x9b8] sm:$0xff]  ;;  %v4009_v36 = vcombine.low %v406_v22, %v410_v23  ;;  %v470_v23 = vld [vmem:[#allocation5 + $0xb50] sm:$0xff] }
 0x195   :  { %2783 = vmatprep.subr.bf16.mxu0 %v3954_v37  ;;  %2912 = vmatprep.subr.bf16.mxu1 %v3956_v38  ;;  %v4011_v37 = vcombine.low %v407_v24, %v411_v26  ;;  %v4018_v38 = vcombine.high %v414_v32, %v418_v33  ;;  %v4020_v40 = vcombine.high %v415_v34, %v419_v35  ;;  %v474_v24 = vld [vmem:[#allocation5 + $0xb70] sm:$0xff]  ;;  %v471_v26 = vld [vmem:[#allocation5 + $0xb58] sm:$0xff] }
 0x198   :  { %2784 = vmatpush1.bf16.msra.mxu0 %v3953_v45  ;;  %2913 = vmatpush1.bf16.msra.mxu1 %v3955_v46  ;;  %v427_v45 = vld [vmem:[#allocation5 + $0x9f8] sm:$0xff]  ;;  %v4017_v46 = vcombine.low %v414_v32, %v418_v33  ;;  %v478_v33 = vld [vmem:[#allocation5 + $0xb90] sm:$0xff] }
 0x199   :  { %2785 = vmatprep.subr.bf16.mxu0 %v3962_v47  ;;  %2914 = vmatprep.subr.bf16.mxu1 %v3964_v48  ;;  %v4019_v47 = vcombine.low %v415_v34, %v419_v35  ;;  %v4026_v48 = vcombine.high %v422_v41, %v426_v43  ;;  %v4028_v49 = vcombine.high %v423_v44, %v427_v45  ;;  %v482_v34 = vld [vmem:[#allocation5 + $0xbb0] sm:$0xff]  ;;  %v479_v35 = vld [vmem:[#allocation5 + $0xb98] sm:$0xff] }
 0x19c   :  { %2786 = vmatpush1.bf16.msra.mxu0 %v3961_v53  ;;  %2915 = vmatpush1.bf16.msra.mxu1 %v3963_v54  ;;  %v435_v53 = vld [vmem:[#allocation5 + $0xa38] sm:$0xff]  ;;  %v4025_v54 = vcombine.low %v422_v41, %v426_v43  ;;  %v486_v43 = vld [vmem:[#allocation5 + $0xbd0] sm:$0xff] }
 0x19d   :  { %2798 = vmatprep.subr.bf16.mxu0 %v3970_v55  ;;  %2927 = vmatprep.subr.bf16.mxu1 %v3972_v56  ;;  %v4027_v55 = vcombine.low %v423_v44, %v427_v45  ;;  %v4034_v56 = vcombine.high %v430_v50, %v434_v51  ;;  %v4036_v57 = vcombine.high %v431_v52, %v435_v53  ;;  %v490_v44 = vld [vmem:[#allocation5 + $0xbf0] sm:$0xff]  ;;  %v487_v45 = vld [vmem:[#allocation5 + $0xbd8] sm:$0xff] }
 0x19f   :  { %2788 = vmatmul.mubr.bf16.vlgmr.msra.gmra.mrb[4].mxu0 %v4605_v30  ;;  %2917 = vmatmul.mubr.bf16.vlgmr.msra.gmra.mrb[4].mxu1 %v4605_v30  ;;  %v3987_v30 = vcombine.low %v383_v4, %v387_v5  ;;  %v450_v4 = vld [vmem:[#allocation5 + $0xab0] sm:$0xff]  ;;  %v447_v5 = vld [vmem:[#allocation5 + $0xa98] sm:$0xff] }
 0x1a0   :  { %2799 = vmatpush1.bf16.msra.mxu0 %v3969_v62  ;;  %2928 = vmatpush1.bf16.msra.mxu1 %v3971_v63  ;;  %v443_v62 = vld [vmem:[#allocation5 + $0xa78] sm:$0xff]  ;;  %v4033_v63 = vcombine.low %v430_v50, %v434_v51  ;;  %v4089_v51 = vcombine.low %v486_v43, %v490_v44 }
 0x1a1   :  { %2800 = vmatprep.subr.bf16.mxu0 %v3978_v0  ;;  %2929 = vmatprep.subr.bf16.mxu1 %v3980_v1  ;;  %v4035_v0 = vcombine.low %v431_v52, %v435_v53  ;;  %v4042_v1 = vcombine.high %v438_v59, %v442_v60  ;;  %v4044_v2 = vcombine.high %v439_v61, %v443_v62  ;;  %v4304_v53 = vld [vmem:[%s4853_s3 + $0x40] sm:$0xff]  }
 0x1a2   :  { %2830 = vmatprep.mubr.bf16.mxu0 %v4607_v39  ;;  %2959 = vmatprep.mubr.bf16.mxu1 %v4607_v39  ;;  %v4004_v39 = vcombine.high %v399_v25, %v403_v18  ;;  %v466_v25 = vld [vmem:[#allocation5 + $0xb30] sm:$0xff]  ;;  %v463_v18 = vld [vmem:[#allocation5 + $0xb18] sm:$0xff] }
 0x1a4   :  { %2801 = vmatpush1.bf16.msra.mxu0 %v3977_v6  ;;  %2930 = vmatpush1.bf16.msra.mxu1 %v3979_v7  ;;  %v451_v6 = vld [vmem:[#allocation5 + $0xab8] sm:$0xff]  ;;  %v4041_v7 = vcombine.low %v438_v59, %v442_v60  ;;  %v4309_v59 = vld [vmem:[%s4853_s3 + $0xc8] sm:$0xff]  }
 0x1a5   :  { %2802 = vmatprep.subr.bf16.mxu0 %v3986_v8  ;;  %2931 = vmatprep.subr.bf16.mxu1 %v3988_v15  ;;  %v4043_v8 = vcombine.low %v439_v61, %v443_v62  ;;  %v4050_v15 = vcombine.high %v446_v3, %v450_v4  ;;  %v4052_v58 = vcombine.high %v447_v5, %v451_v6  ;;  %v4310_v60 = vld [vmem:[%s4853_s3 + $0x8] sm:$0xff]   ;;  %v4312_v62 = vld [vmem:[%s4853_s3 + $0x50] sm:$0xff]  }
 0x1a6   :  { %v4311_v61 = vld [vmem:[%s4853_s3 + $0x88] sm:$0xff]  }
 0x1a8   :  { %2803 = vmatpush1.bf16.msra.mxu0 %v3985_v12  ;;  %2932 = vmatpush1.bf16.msra.mxu1 %v3987_v30  ;;  %v459_v12 = vld [vmem:[#allocation5 + $0xaf8] sm:$0xff]  ;;  %v4049_v30 = vcombine.low %v446_v3, %v450_v4 }
 0x1a9   :  { %2804 = vmatprep.subr.bf16.mxu0 %v3994_v13  ;;  %2933 = vmatprep.subr.bf16.mxu1 %v3996_v14  ;;  %v4051_v13 = vcombine.low %v447_v5, %v451_v6  ;;  %v4058_v14 = vcombine.high %v454_v9, %v458_v10  ;;  %v4060_v16 = vcombine.high %v455_v11, %v459_v12  ;;  %v4317_v3 = vld [vmem:[%s4853_s3 + $0xd8] sm:$0xff]  }
 0x1aa   :  { %v4318_v5 = vld [vmem:[%s4853_s3 + $0x18] sm:$0xff]  }
 0x1ab   :  { %v4319_v6 = vld [vmem:[%s4853_s3 + $0x98] sm:$0xff]  }
 0x1ac   :  { %2805 = vmatpush1.bf16.msra.mxu0 %v3993_v19  ;;  %2934 = vmatpush1.bf16.msra.mxu1 %v3995_v20  ;;  %v467_v19 = vld [vmem:[#allocation5 + $0xb38] sm:$0xff]  ;;  %v4057_v20 = vcombine.low %v454_v9, %v458_v10  ;;  %v4689_v9 = vld [vmem:[#allocation7] sm:$0xff] }
 0x1ad   :  { %2806 = vmatprep.subr.bf16.mxu0 %v4002_v21  ;;  %2935 = vmatprep.subr.bf16.mxu1 %v4004_v39  ;;  %v4059_v21 = vcombine.low %v455_v11, %v459_v12  ;;  %v4066_v39 = vcombine.high %v462_v17, %v466_v25  ;;  %v4068_v22 = vcombine.high %v463_v18, %v467_v19  ;;  %v4323_v12 = vld [vmem:[%s4853_s3 + $0xa0] sm:$0xff]  }
 0x1b0   :  { %2807 = vmatpush1.bf16.msra.mxu0 %v4001_v27  ;;  %2936 = vmatpush1.bf16.msra.mxu1 %v4003_v28  ;;  %v475_v27 = vld [vmem:[#allocation5 + $0xb78] sm:$0xff]  ;;  %v4065_v28 = vcombine.low %v462_v17, %v466_v25 }
 0x1b1   :  { %2808 = vmatprep.subr.bf16.mxu0 %v4010_v29  ;;  %2937 = vmatprep.subr.bf16.mxu1 %v4012_v31  ;;  %v4067_v29 = vcombine.low %v463_v18, %v467_v19  ;;  %v4074_v31 = vcombine.high %v470_v23, %v474_v24  ;;  %v4076_v32 = vcombine.high %v471_v26, %v475_v27  ;;  %v4326_v18 = vld [vmem:[%s4853_s3 + $0x28] sm:$0xff]  }
 0x1b4   :  { %2809 = vmatpush1.bf16.msra.mxu0 %v4009_v36  ;;  %2938 = vmatpush1.bf16.msra.mxu1 %v4011_v37  ;;  %v483_v36 = vld [vmem:[#allocation5 + $0xbb8] sm:$0xff]  ;;  %v4073_v37 = vcombine.low %v470_v23, %v474_v24 }
 0x1b5   :  { %2810 = vmatprep.subr.bf16.mxu0 %v4018_v38  ;;  %2939 = vmatprep.subr.bf16.mxu1 %v4020_v40  ;;  %v4075_v38 = vcombine.low %v471_v26, %v475_v27  ;;  %v4082_v40 = vcombine.high %v478_v33, %v482_v34  ;;  %v4084_v41 = vcombine.high %v479_v35, %v483_v36 }
 0x1b8   :  { %2811 = vmatpush1.bf16.msra.mxu0 %v4017_v46  ;;  %2940 = vmatpush1.bf16.msra.mxu1 %v4019_v47  ;;  %v491_v46 = vld [vmem:[#allocation5 + $0xbf8] sm:$0xff]  ;;  %v4081_v47 = vcombine.low %v478_v33, %v482_v34 }
 0x1b9   :  { %2812 = vmatprep.subr.bf16.mxu0 %v4026_v48  ;;  %2941 = vmatprep.subr.bf16.mxu1 %v4028_v49  ;;  %v4083_v48 = vcombine.low %v479_v35, %v483_v36  ;;  %v4090_v49 = vcombine.high %v486_v43, %v490_v44  ;;  %v4092_v50 = vcombine.high %v487_v45, %v491_v46  ;;  %v4333_v44 = vld [vmem:[%s4853_s3 + $0xf8] sm:$0xff]  }
 0x1ba   :  { %v4091_v52 = vcombine.low %v487_v45, %v491_v46 }
 0x1bc   :  { %2813 = vmatpush1.bf16.msra.mxu0 %v4025_v54  ;;  %2942 = vmatpush1.bf16.msra.mxu1 %v4027_v55  ;;  %v4305_v54 = vld [vmem:[%s4853_s3 + $0xc0] sm:$0xff]  }
 0x1bd   :  { %2814 = vmatprep.subr.bf16.mxu0 %v4034_v56  ;;  %2943 = vmatprep.subr.bf16.mxu1 %v4036_v57  ;;  %v4306_v55 = vld [vmem:[%s4853_s3] sm:$0xff]   ;;  %v4308_v57 = vld [vmem:[%s4853_s3 + $0x48] sm:$0xff]  }
 0x1be   :  { %v4307_v56 = vld [vmem:[%s4853_s3 + $0x80] sm:$0xff]  }
 0x1c0   :  { %2815 = vmatpush1.bf16.msra.mxu0 %v4033_v63  ;;  %2944 = vmatpush1.bf16.msra.mxu1 %v4035_v0  ;;  %v494_v63 = vlaneseq  ;;  %v4314_v0 = vld [vmem:[%s4853_s3 + $0x10] sm:$0xff]  }
 0x1c1   :  { %2816 = vmatprep.subr.bf16.mxu0 %v4042_v1  ;;  %2945 = vmatprep.subr.bf16.mxu1 %v4044_v2  ;;  %v4315_v1 = vld [vmem:[%s4853_s3 + $0x90] sm:$0xff]   ;;  %v4316_v2 = vld [vmem:[%s4853_s3 + $0x58] sm:$0xff]  }
 0x1c2   :  { %v4671_v4 = vshrl.u32 %v494_v63, 7  ;;  %v4339_v63 = vld [vmem:[%s4853_s3 + $0x180] sm:$0xff]  }
 0x1c4   :  { %2817 = vmatpush1.bf16.msra.mxu0 %v4041_v7  ;;  %2946 = vmatpush1.bf16.msra.mxu1 %v4043_v8  ;;  %v4320_v7 = vld [vmem:[%s4853_s3 + $0x60] sm:$0xff]   ;;  %v504_v10 = vsub.s32 2, %v4671_v4  ;;  %v500_v11 = vsub.s32 1, %v4671_v4 }
 0x1c5   :  { %2818 = vmatprep.subr.bf16.mxu0 %v4050_v15  ;;  %2947 = vmatprep.subr.bf16.mxu1 %v4052_v58  ;;  %v4321_v8 = vld [vmem:[%s4853_s3 + $0xe0] sm:$0xff]   ;;  %v496_v15 = vsub.s32 0, %v4671_v4 }
 0x1c6   :  { %v4322_v58 = vld [vmem:[%s4853_s3 + $0x20] sm:$0xff]   ;;  %v505_v17 = vrot.slane %v4689_v9, %v504_v10  ;;  %v501_v25 = vrot.slane %v4689_v9, %v500_v11  ;;  %v4350_v10 = vld [vmem:[%s4853_s3 + $0x118] sm:$0xff]  }
 0x1c7   :  { %v4351_v11 = vld [vmem:[%s4853_s3 + $0x198] sm:$0xff]  }
 0x1c8   :  { %2819 = vmatpush1.bf16.msra.mxu0 %v4049_v30  ;;  %2948 = vmatpush1.bf16.msra.mxu1 %v4051_v13  ;;  %v508_v30 = vsub.s32 3, %v4671_v4  ;;  %v4324_v13 = vld [vmem:[%s4853_s3 + $0x68] sm:$0xff]  }
 0x1c9   :  { %2820 = vmatprep.subr.bf16.mxu0 %v4058_v14  ;;  %2949 = vmatprep.subr.bf16.mxu1 %v4060_v16  ;;  %v4325_v14 = vld [vmem:[%s4853_s3 + $0xe8] sm:$0xff]   ;;  %v497_v16 = vrot.slane %v4689_v9, %v496_v15  ;;  %v4348_v15 = vld [vmem:[%s4853_s3 + $0x158] sm:$0xff]  }
 0x1ca   :  { %v509_v19 = vrot.slane %v4689_v9, %v508_v30  ;;  %v4353_v30 = vld [vmem:[%s4853_s3 + $0x1e0] sm:$0xff]  }
 0x1cc   :  { %2821 = vmatpush1.bf16.msra.mxu0 %v4057_v20  ;;  %2950 = vmatpush1.bf16.msra.mxu1 %v4059_v21  ;;  %v4327_v20 = vld [vmem:[%s4853_s3 + $0xa8] sm:$0xff]   ;;  %v4328_v21 = vld [vmem:[%s4853_s3 + $0x70] sm:$0xff]  }
 0x1cd   :  { %2822 = vmatprep.subr.bf16.mxu0 %v4066_v39  ;;  %2951 = vmatprep.subr.bf16.mxu1 %v4068_v22  ;;  %v4329_v22 = vld [vmem:[%s4853_s3 + $0xf0] sm:$0xff]  }
 0x1d0   :  { %2823 = vmatpush1.bf16.msra.mxu0 %v4065_v28  ;;  %2952 = vmatpush1.bf16.msra.mxu1 %v4067_v29 }
 0x1d1   :  { %2824 = vmatprep.subr.bf16.mxu0 %v4074_v31  ;;  %2953 = vmatprep.subr.bf16.mxu1 %v4076_v32  ;;  %v4330_v32 = vld [vmem:[%s4853_s3 + $0x30] sm:$0xff]  }
 0x1d4   :  { %2825 = vmatpush1.bf16.msra.mxu0 %v4073_v37  ;;  %2954 = vmatpush1.bf16.msra.mxu1 %v4075_v38  ;;  %v4331_v37 = vld [vmem:[%s4853_s3 + $0xb0] sm:$0xff]   ;;  %v4332_v38 = vld [vmem:[%s4853_s3 + $0x78] sm:$0xff]  }
 0x1d5   :  { %2826 = vmatprep.subr.bf16.mxu0 %v4082_v40  ;;  %2955 = vmatprep.subr.bf16.mxu1 %v4084_v41 }
 0x1d8   :  { %2827 = vmatpush1.bf16.msra.mxu0 %v4081_v47  ;;  %2956 = vmatpush1.bf16.msra.mxu1 %v4083_v48 }
 0x1d9   :  { %2828 = vmatprep.subr.bf16.mxu0 %v4090_v49  ;;  %2957 = vmatprep.subr.bf16.mxu1 %v4092_v50 }
 0x1dc   :  { %2829 = vmatpush1.bf16.msra.mxu0 %v4089_v51  ;;  %2958 = vmatpush1.bf16.msra.mxu1 %v4091_v52  ;;  %v4334_v52 = vld [vmem:[%s4853_s3 + $0x38] sm:$0xff]  }
 0x1dd   :  { %4159 = vmatprep.subr.bf16.mxu0 %v4304_v53  ;;  %4181 = vmatprep.subr.bf16.mxu1 %v4305_v54 }
 0x1df   :  { %2831 = vmatmul.mubr.bf16.vlgmr.msra.gmra.mrb[4].mxu0 %v4613_v42  ;;  %2960 = vmatmul.mubr.bf16.vlgmr.msra.gmra.mrb[4].mxu1 %v4613_v42  ;;  %v4313_v42 = vld [vmem:[%s4853_s3 + $0xd0] sm:$0xff]  }
 0x1e0   :  { %4160 = vmatpush3.bf16.msra.mxu0 %v4306_v55  ;;  %4182 = vmatpush3.bf16.msra.mxu1 %v4307_v56  ;;  %v4335_v56 = vld [vmem:[%s4853_s3 + $0xb8] sm:$0xff]  }
 0x1e1   :  { %4161 = vmatprep.subr.bf16.mxu0 %v4308_v57  ;;  %4183 = vmatprep.subr.bf16.mxu1 %v4309_v59 }
 0x1e4   :  { %4162 = vmatpush3.bf16.msra.mxu0 %v4310_v60  ;;  %4184 = vmatpush3.bf16.msra.mxu1 %v4311_v61  ;;  %v4336_v60 = vld [vmem:[%s4853_s3 + $0x140] sm:$0xff]  }
 0x1e5   :  { %4163 = vmatprep.subr.bf16.mxu0 %v4312_v62  ;;  %4185 = vmatprep.subr.bf16.mxu1 %v4313_v42  ;;  %v4337_v61 = vld [vmem:[%s4853_s3 + $0x1c0] sm:$0xff]  }
 0x1e6   :  { %v4338_v42 = vld [vmem:[%s4853_s3 + $0x100] sm:$0xff]  }
 0x1e8   :  { %4164 = vmatpush3.bf16.msra.mxu0 %v4314_v0  ;;  %4186 = vmatpush3.bf16.msra.mxu1 %v4315_v1  ;;  %v4340_v0 = vld [vmem:[%s4853_s3 + $0x148] sm:$0xff]  }
 0x1e9   :  { %4165 = vmatprep.subr.bf16.mxu0 %v4316_v2  ;;  %4187 = vmatprep.subr.bf16.mxu1 %v4317_v3  ;;  %v4341_v1 = vld [vmem:[%s4853_s3 + $0x1c8] sm:$0xff]  }
 0x1ea   :  { %v4342_v2 = vld [vmem:[%s4853_s3 + $0x108] sm:$0xff]  }
 0x1eb   :  { %v4343_v3 = vld [vmem:[%s4853_s3 + $0x188] sm:$0xff]  }
 0x1ec   :  { %4166 = vmatpush3.bf16.msra.mxu0 %v4318_v5  ;;  %4188 = vmatpush3.bf16.msra.mxu1 %v4319_v6  ;;  %v4344_v5 = vld [vmem:[%s4853_s3 + $0x150] sm:$0xff]  }
 0x1ed   :  { %4167 = vmatprep.subr.bf16.mxu0 %v4320_v7  ;;  %4189 = vmatprep.subr.bf16.mxu1 %v4321_v8  ;;  %v4345_v6 = vld [vmem:[%s4853_s3 + $0x1d0] sm:$0xff]  }
 0x1ee   :  { %v4346_v7 = vld [vmem:[%s4853_s3 + $0x110] sm:$0xff]  }
 0x1ef   :  { %v4347_v8 = vld [vmem:[%s4853_s3 + $0x190] sm:$0xff]  }
 0x1f0   :  { %4168 = vmatpush3.bf16.msra.mxu0 %v4322_v58  ;;  %4190 = vmatpush3.bf16.msra.mxu1 %v4323_v12  ;;  %v4349_v58 = vld [vmem:[%s4853_s3 + $0x1d8] sm:$0xff]   ;;  %v4352_v12 = vld [vmem:[%s4853_s3 + $0x160] sm:$0xff]  }
 0x1f1   :  { %4169 = vmatprep.subr.bf16.mxu0 %v4324_v13  ;;  %4191 = vmatprep.subr.bf16.mxu1 %v4325_v14  ;;  %v4354_v13 = vld [vmem:[%s4853_s3 + $0x120] sm:$0xff]  }
 0x1f2   :  { %v2574_v39 = vpop.f32.mrb[0].mxu0  ;;  %v2703_v24 = vpop.f32.mrb[0].mxu1  ;;  %v4355_v14 = vld [vmem:[%s4853_s3 + $0x1a0] sm:$0xff]  }
 0x1f3   :  { %v4247_v23 = vadd.f32 %v2574_v39, %v497_v16  ;;  %v2576_v26 = vpop.f32.mrb[1].mxu0  ;;  %v4251_v27 = vadd.f32 %v2703_v24, %v505_v17  ;;  %v2705_v29 = vpop.f32.mrb[1].mxu1  ;;  %v4363_v39 = vld [vmem:[%s4853_s3 + $0x1b0] sm:$0xff]   ;;  %v4366_v24 = vld [vmem:[%s4853_s3 + $0x138] sm:$0xff]  }
 0x1f4   :  { %v4248_v28 = vadd.f32 %v2576_v26, %v501_v25  ;;  %v2578_v31 = vpop.f32.mrb[2].mxu0  ;;  %4170 = vmatpush3.bf16.msra.mxu0 %v4326_v18  ;;  %v4252_v33 = vadd.f32 %v2705_v29, %v509_v19  ;;  %v2707_v35 = vpop.f32.mrb[2].mxu1  ;;  %4192 = vmatpush3.bf16.msra.mxu1 %v4327_v20  ;;  %v4359_v18 = vld [vmem:[%s4853_s3 + $0x1a8] sm:$0xff]   ;;  %v4361_v20 = vld [vmem:[%s4853_s3 + $0x1f0] sm:$0xff]   ;;  %v4367_v26 = vld [vmem:[%s4853_s3 + $0x1b8] sm:$0xff]   ;;  %v516_v29 = vsub.s32 5, %v4671_v4 }
 0x1f5   :  { %v4249_v34 = vadd.f32 %v2578_v31, %v497_v16  ;;  %v2580_v36 = vpop.f32.mrb[3].mxu0  ;;  %4171 = vmatprep.subr.bf16.mxu0 %v4328_v21  ;;  %v4253_v40 = vadd.f32 %v2707_v35, %v505_v17  ;;  %v2709_v43 = vpop.f32.mrb[3].mxu1  ;;  %4193 = vmatprep.subr.bf16.mxu1 %v4329_v22  ;;  %v2970_v45 = vmax.f32 %v4247_v23, 0.0  ;;  %v2972_v48 = vmax.f32 %v4251_v27, 0.0  ;;  %v4356_v16 = vld [vmem:[%s4853_s3 + $0x168] sm:$0xff]   ;;  %v4362_v21 = vld [vmem:[%s4853_s3 + $0x130] sm:$0xff]  }
 0x1f6   :  { %v4250_v41 = vadd.f32 %v2580_v36, %v501_v25  ;;  %v4254_v47 = vadd.f32 %v2709_v43, %v509_v19  ;;  %v2971_v49 = vmax.f32 %v4248_v28, 0.0  ;;  %v2973_v53 = vmax.f32 %v4252_v33, 0.0  ;;  %v4357_v17 = vld [vmem:[%s4853_s3 + $0x1e8] sm:$0xff]   ;;  %v4360_v19 = vld [vmem:[%s4853_s3 + $0x170] sm:$0xff]   ;;  %v4364_v22 = vld [vmem:[%s4853_s3 + $0x178] sm:$0xff]  }
 0x1f7   :  { %v2978_v46 = vmax.f32 %v4249_v34, 0.0  ;;  %v2980_v50 = vmax.f32 %v4253_v40, 0.0  ;;  %v4358_v25 = vld [vmem:[%s4853_s3 + $0x128] sm:$0xff]   ;;  %v4365_v23 = vld [vmem:[%s4853_s3 + $0x1f8] sm:$0xff]   ;;  %v512_v27 = vsub.s32 4, %v4671_v4  ;;  %v520_v28 = vsub.s32 6, %v4671_v4 }
 0x1f8   :  { %v2979_v51 = vmax.f32 %v4250_v41, 0.0  ;;  %4172 = vmatpush3.bf16.msra.mxu0 %v4330_v32  ;;  %v2981_v55 = vmax.f32 %v4254_v47, 0.0  ;;  %4194 = vmatpush3.bf16.msra.mxu1 %v4331_v37  ;;  %v524_v31 = vsub.s32 7, %v4671_v4  ;;  %v517_v34 = vrot.slane %v4689_v9, %v516_v29 }
 0x1f9   :  { %v2986_v54 = vpack.c.bf16 %v2978_v46, %v2970_v45  ;;  %4173 = vmatprep.subr.bf16.mxu0 %v4332_v38  ;;  %v2988_v57 = vpack.c.bf16 %v2980_v50, %v2972_v48  ;;  %4195 = vmatprep.subr.bf16.mxu1 %v4333_v44  ;;  %v513_v32 = vrot.slane %v4689_v9, %v512_v27 }
 0x1fa   :  { %v2987_v59 = vpack.c.bf16 %v2979_v51, %v2971_v49  ;;  %v2989_v62 = vpack.c.bf16 %v2981_v55, %v2973_v53  ;;  %v521_v33 = vrot.slane %v4689_v9, %v520_v28  ;;  %v525_v35 = vrot.slane %v4689_v9, %v524_v31 }
 0x1fc   :  { %4174 = vmatpush3.bf16.msra.mxu0 %v4334_v52  ;;  %3545 = vmatprep.mubr.bf16.mxu0 %v2987_v59 }
 0x1fd   :  { %4196 = vmatpush3.bf16.msra.mxu1 %v4335_v56  ;;  %3586 = vmatprep.mubr.bf16.mxu1 %v2989_v62 }
 0x1fe   :  { %4203 = vmatprep.subr.bf16.mxu0 %v4336_v60  ;;  %4225 = vmatprep.subr.bf16.mxu1 %v4337_v61 }
 0x1ff   :  { %3546 = vmatmul.mubr.bf16.vlgmr.msra.gmra.mrb[8].mxu0 %v2986_v54 }
 0x200   :  { %3587 = vmatmul.mubr.bf16.vlgmr.msra.gmra.mrb[8].mxu1 %v2988_v57  ;;  %4204 = vmatpush3.bf16.msra.mxu0 %v4338_v42 }
 0x201   :  { %4226 = vmatpush3.bf16.msra.mxu1 %v4339_v63  ;;  %4205 = vmatprep.subr.bf16.mxu0 %v4340_v0 }
 0x202   :  { %4227 = vmatprep.subr.bf16.mxu1 %v4341_v1 }
 0x204   :  { %4206 = vmatpush3.bf16.msra.mxu0 %v4342_v2  ;;  %v4093_v2 = vld [vmem:[#allocation8] ss:$0 sm:$0xff] }
 0x205   :  { %4228 = vmatpush3.bf16.msra.mxu1 %v4343_v3  ;;  %4207 = vmatprep.subr.bf16.mxu0 %v4344_v5 }
 0x206   :  { %4229 = vmatprep.subr.bf16.mxu1 %v4345_v6 }
 0x208   :  { %4208 = vmatpush3.bf16.msra.mxu0 %v4346_v7 }
 0x209   :  { %4230 = vmatpush3.bf16.msra.mxu1 %v4347_v8  ;;  %4209 = vmatprep.subr.bf16.mxu0 %v4348_v15 }
 0x20a   :  { %4231 = vmatprep.subr.bf16.mxu1 %v4349_v58 }
 0x20c   :  { %4210 = vmatpush3.bf16.msra.mxu0 %v4350_v10 }
 0x20d   :  { %4232 = vmatpush3.bf16.msra.mxu1 %v4351_v11  ;;  %4211 = vmatprep.subr.bf16.mxu0 %v4352_v12 }
 0x20e   :  { %4233 = vmatprep.subr.bf16.mxu1 %v4353_v30 }
 0x210   :  { %4212 = vmatpush3.bf16.msra.mxu0 %v4354_v13 }
 0x211   :  { %4234 = vmatpush3.bf16.msra.mxu1 %v4355_v14  ;;  %4213 = vmatprep.subr.bf16.mxu0 %v4356_v16 }
 0x212   :  { %4235 = vmatprep.subr.bf16.mxu1 %v4357_v17 }
 0x214   :  { %4214 = vmatpush3.bf16.msra.mxu0 %v4358_v25 }
 0x215   :  { %4236 = vmatpush3.bf16.msra.mxu1 %v4359_v18  ;;  %4215 = vmatprep.subr.bf16.mxu0 %v4360_v19 }
 0x216   :  { %4237 = vmatprep.subr.bf16.mxu1 %v4361_v20 }
 0x218   :  { %4216 = vmatpush3.bf16.msra.mxu0 %v4362_v21 }
 0x219   :  { %4238 = vmatpush3.bf16.msra.mxu1 %v4363_v39  ;;  %4217 = vmatprep.subr.bf16.mxu0 %v4364_v22 }
 0x21a   :  { %4239 = vmatprep.subr.bf16.mxu1 %v4365_v23 }
 0x21c   :  { %4218 = vmatpush3.bf16.msra.mxu0 %v4366_v24 }
 0x21d   :  { %4240 = vmatpush3.bf16.msra.mxu1 %v4367_v26 }
 0x2b2   :  { %v2832_v36 = vpop.f32.mrb[4].mxu0  ;;  %v2961_v38 = vpop.f32.mrb[4].mxu1 }
 0x2b3   :  { %v4255_v37 = vadd.f32 %v2832_v36, %v513_v32  ;;  %v2834_v40 = vpop.f32.mrb[5].mxu0  ;;  %v4259_v41 = vadd.f32 %v2961_v38, %v521_v33  ;;  %v2963_v44 = vpop.f32.mrb[5].mxu1 }
 0x2b4   :  { %v4256_v43 = vadd.f32 %v2834_v40, %v517_v34  ;;  %v2836_v45 = vpop.f32.mrb[6].mxu0  ;;  %v4260_v46 = vadd.f32 %v2963_v44, %v525_v35  ;;  %v2965_v48 = vpop.f32.mrb[6].mxu1 }
 0x2b5   :  { %v4257_v47 = vadd.f32 %v2836_v45, %v513_v32  ;;  %v2838_v4 = vpop.f32.mrb[7].mxu0  ;;  %v4261_v49 = vadd.f32 %v2965_v48, %v521_v33  ;;  %v2967_v51 = vpop.f32.mrb[7].mxu1  ;;  %v2974_v52 = vmax.f32 %v4255_v37, 0.0  ;;  %v2976_v55 = vmax.f32 %v4259_v41, 0.0  ;;  %v4158_v32 = vld [vmem:[#allocation10] ss:$0 sm:$0xff] }
 0x2b6   :  { %v4258_v50 = vadd.f32 %v2838_v4, %v517_v34  ;;  %v4262_v54 = vadd.f32 %v2967_v51, %v525_v35  ;;  %v2975_v9 = vmax.f32 %v4256_v43, 0.0  ;;  %v2977_v59 = vmax.f32 %v4260_v46, 0.0 }
 0x2b7   :  { %v2982_v53 = vmax.f32 %v4257_v47, 0.0  ;;  %v2984_v56 = vmax.f32 %v4261_v49, 0.0  ;;  %v3696_v41 = vstv %s4856_s6 }
 0x2b8   :  { %v2983_v57 = vmax.f32 %v4258_v50, 0.0  ;;  %v2985_v61 = vmax.f32 %v4262_v54, 0.0 }
 0x2b9   :  { %v2990_v60 = vpack.c.bf16 %v2982_v53, %v2974_v52  ;;  %v2992_v62 = vpack.c.bf16 %v2984_v56, %v2976_v55 }
 0x2ba   :  { %v2991_v42 = vpack.c.bf16 %v2983_v57, %v2975_v9  ;;  %v2993_v63 = vpack.c.bf16 %v2985_v61, %v2977_v59 }
 0x2bc   :  { %3627 = vmatprep.mubr.bf16.mxu0 %v2991_v42  ;;  %3668 = vmatprep.mubr.bf16.mxu1 %v2993_v63 }
 0x2bd   :  { %3628 = vmatmul.mubr.bf16.vlgmr.msra.gmra.mrb[12].mxu0 %v2990_v60  ;;  %3669 = vmatmul.mubr.bf16.vlgmr.msra.gmra.mrb[12].mxu1 %v2992_v62 }
 0x2d2   :  { %v4175_v0 = vpop.f32.mrb[8].mxu0 }
 0x2d3   :  { %v4197_v1 = vpop.f32.mrb[8].mxu1  ;;  %v4176_v3 = vpop.f32.mrb[9].mxu0 }
 0x2d4   :  { %v4177_v5 = vadd.f32 %v4176_v3, %v4175_v0  ;;  %v4198_v6 = vpop.f32.mrb[9].mxu1  ;;  %v4178_v7 = vpop.f32.mrb[10].mxu0 }
 0x2d5   :  { %v4199_v8 = vadd.f32 %v4198_v6, %v4197_v1  ;;  %v4200_v15 = vpop.f32.mrb[10].mxu1  ;;  %v4179_v58 = vpop.f32.mrb[11].mxu0 }
 0x2d6   :  { %v3548_v10 = vadd.f32 %v4177_v5, %v4093_v2  ;;  %v4180_v11 = vadd.f32 %v4179_v58, %v4178_v7  ;;  %v4201_v12 = vpop.f32.mrb[11].mxu1 }
 0x2d7   :  { %v4202_v30 = vadd.f32 %v4201_v12, %v4200_v15 }
 0x2d8   :  { %v3589_v13 = vadd.f32 %v4199_v8, %v3548_v10  ;;  %v3551_v14 = vadd.f32 %v4180_v11, %v4093_v2 }
 0x2da   :  { %v3592_v16 = vadd.f32 %v4202_v30, %v3551_v14 }
 0x390   :  { %v4219_v17 = vpop.f32.mrb[12].mxu0  ;;  %v4241_v25 = vpop.f32.mrb[12].mxu1 }
 0x391   :  { %v4220_v18 = vpop.f32.mrb[13].mxu0  ;;  %v4242_v20 = vpop.f32.mrb[13].mxu1 }
 0x392   :  { %v4221_v19 = vadd.f32 %v4220_v18, %v4219_v17  ;;  %v4222_v21 = vpop.f32.mrb[14].mxu0  ;;  %v4243_v39 = vadd.f32 %v4242_v20, %v4241_v25  ;;  %v4244_v22 = vpop.f32.mrb[14].mxu1 }
 0x393   :  { %v4223_v23 = vpop.f32.mrb[15].mxu0  ;;  %v4245_v27 = vpop.f32.mrb[15].mxu1 }
 0x394   :  { %v3630_v24 = vadd.f32 %v4221_v19, %v3589_v13  ;;  %v4224_v26 = vadd.f32 %v4223_v23, %v4222_v21  ;;  %v4246_v28 = vadd.f32 %v4245_v27, %v4244_v22 }
 0x396   :  { %v3671_v29 = vadd.f32 %v4243_v39, %v3630_v24  ;;  %v3633_v31 = vadd.f32 %v4224_v26, %v3592_v16 }
 0x398   :  { %v3677_v33 = vmax.f32 %v3671_v29, 0.0  ;;  %v3674_v34 = vadd.f32 %v4246_v28, %v3633_v31 }
 0x39a   :  { %v3678_v35 = vmax.f32 %v3674_v34, 0.0  ;;  %v3686_v36 = vmul.f32 %v4158_v32, %v3677_v33 }
 0x39c   :  { %v3689_v37 = vsel %vm3688_vm0, %v3686_v36, 0.0  ;;  %v3687_v38 = vmul.f32 %v4158_v32, %v3678_v35 }
 0x39d   :  { %3690 = vadd.xlane.f32.xlu0 %v3689_v37 }
 0x39e   :  { %v3692_v40 = vsel %vm3688_vm0, %v3687_v38, 0.0 }
 0x3a1   :  { %3693 = vadd.xlane.f32.xlu0 %v3692_v40 }
 0x42a   :  { %v3691_v43 = vpop.xlane.xlu0 %3690 }
 0x42b   :  { %v3697_v44 = vadd.f32 %v3696_v41, %v3691_v43 }
 0x42d   :  { %3700 = vst.msk [vmem:[%s4857_s7] sm:$0xff] %vm3699_vm1, %v3697_v44 }
 0x42e   :  { %v3694_v45 = vpop.xlane.xlu0 %3693 }
 0x42f   :  { %v3698_v46 = vadd.f32 %v3696_v41, %v3694_v45 }
 0x431   :  { %3701 = vst.msk [vmem:[%s4857_s7 + $0x8] sm:$0xff] %vm3699_vm1, %v3698_v46 }
 0x432   :  { %3706 = vsyncpa [#allocation4], 1 }
 0x433   :  { %3707 = vsyncpa [#allocation6], 1 }
 0x434   :  { %3708 = vsyncpa [#allocation9], 1 }

</bundles_post_ra>
